<compile_context>
chip_gen: v7x
topology: tpu7x:2x2x1
jax: 0.10.0
libtpu: 0.0.40
codegen_flags: <defaults>
</compile_context>

<pallas_src>
import jax
import jax.numpy as jnp
import numpy as np
from jax.experimental import pallas as pl
from jax.experimental.pallas import tpu as pltpu

_NB_MAX = 8  # images fused per grid step in the features kernel


# ---------------------------------------------------------------------------
# Kernel 1: conv1 -> relu -> pool1 -> conv2 -> relu -> pool2, NB images / step
# Everything channel-major: arrays are (channels, nb*256) with the per-image
# padded 16x16 pool-1 grid flattened onto lanes (col = n*256 + 16*hp + wp).
# ---------------------------------------------------------------------------
def _encoder_features_kernel(a1_ref, w1_ref, b1_ref, w2_ref, b2_ref, s2_ref,
                             o_ref, p1_ref, p1e_ref, z2_ref):
    nb = o_ref.shape[0]
    m2 = nb * 256

    # --- conv1 + relu + maxpool1 ------------------------------------------
    # a1_ref[q] is (9, nb*256): tap-major patches for pool-window corner q.
    # relu(max_q(z_q) + b) == max_q(relu(z_q + b)) since the bias is shared.
    z = jnp.dot(w1_ref[...], a1_ref[0], preferred_element_type=jnp.float32)
    for q in range(1, 4):
        z = jnp.maximum(
            z, jnp.dot(w1_ref[...], a1_ref[q],
                       preferred_element_type=jnp.float32))
    p1_ref[:, 0:m2] = jnp.maximum(z + b1_ref[...], 0.0)
    pad_w = p1_ref.shape[1] - m2
    # Zero the tail pad every step (junk conv2 columns read it; must stay finite).
    p1_ref[:, m2:] = jnp.zeros((p1_ref.shape[0], pad_w), jnp.float32)

    # --- dx-expansion: p1e[32*dx + c, j] = p1[c, j + dx] --------------------
    # Folds the 3 horizontal conv2 taps into the contraction axis (K=96).
    for dx in range(3):
        p1e_ref[32 * dx:32 * (dx + 1), :] = p1_ref[:, dx:dx + p1e_ref.shape[1]]

    # --- conv2 = 3 accumulating K=96 dots over the vertical taps + relu ----
    acc = jnp.dot(w2_ref[0], p1e_ref[:, 0:m2],
                  preferred_element_type=jnp.float32)
    acc = acc + jnp.dot(w2_ref[1], p1e_ref[:, 16:16 + m2],
                        preferred_element_type=jnp.float32)
    acc = acc + jnp.dot(w2_ref[2], p1e_ref[:, 32:32 + m2],
                        preferred_element_type=jnp.float32)
    z2_ref[...] = jnp.maximum(acc + b2_ref[...], 0.0)   # (64, nb*256)

    # --- maxpool2: shifted element-wise maxes + per-image 0/1 selection ----
    zv = jnp.maximum(z2_ref[:, 0:m2 - 16], z2_ref[:, 16:m2])
    zh = jnp.maximum(zv[:, 0:m2 - 17], zv[:, 1:m2 - 16])
    # pooled[(c, 7*h3+w3)] lives at zh column n*256 + 32*h3 + 2*w3.
    for n in range(nb):
        o_ref[n] = jnp.dot(zh[:, n * 256:n * 256 + 205], s2_ref[...],
                           preferred_element_type=jnp.float32)


def encoder_features(a1, w1t, b1, w2t, b2, s2t, *, bp, nb):
    m2 = nb * 256
    flops = 2 * bp * 256 * (4 * 9 * 32 + 3 * 96 * 64) + 2 * bp * 64 * 205 * 49
    bytes_acc = 4 * (a1.size + bp * 64 * 49 + w1t.size + b1.size
                     + w2t.size + b2.size + s2t.size)
    return pl.pallas_call(
        _encoder_features_kernel,
        out_shape=jax.ShapeDtypeStruct((bp, 64, 49), jnp.float32),
        grid_spec=pltpu.PrefetchScalarGridSpec(
            num_scalar_prefetch=0,
            grid=(bp // nb,),
            in_specs=[
                pl.BlockSpec((4, 9, m2), lambda g: (0, 0, g)),
                pl.BlockSpec((32, 9), lambda g: (0, 0)),
                pl.BlockSpec((32, 1), lambda g: (0, 0)),
                pl.BlockSpec((3, 64, 96), lambda g: (0, 0, 0)),
                pl.BlockSpec((64, 1), lambda g: (0, 0)),
                pl.BlockSpec((205, 49), lambda g: (0, 0)),
            ],
            out_specs=pl.BlockSpec((nb, 64, 49), lambda g: (g, 0, 0)),
            scratch_shapes=[
                pltpu.VMEM((32, m2 + 64), jnp.float32),   # p1  (padded pool-1 map)
                pltpu.VMEM((96, m2 + 32), jnp.float32),   # p1e (dx-expanded)
                pltpu.VMEM((64, m2), jnp.float32),        # relu(conv2)
            ]),
        compiler_params=pltpu.CompilerParams(
            dimension_semantics=("parallel",),
            vmem_limit_bytes=32 << 20),
        cost_estimate=pl.CostEstimate(
            flops=int(flops), transcendentals=0, bytes_accessed=int(bytes_acc)),
    )(a1, w1t, b1, w2t, b2, s2t)


# ---------------------------------------------------------------------------
# Kernel 2: fused VAE head (mu | logvar in one lane-dense matmul) + exp
# ---------------------------------------------------------------------------
def _vae_head_kernel(h_ref, w_ref, b_ref, mu_ref, sigma_ref):
    half = mu_ref.shape[1]
    z = jnp.dot(h_ref[...].astype(jnp.bfloat16), w_ref[...],
                preferred_element_type=jnp.float32) + b_ref[...]
    mu_ref[...] = z[:, :half].astype(mu_ref.dtype)
    sigma_ref[...] = jnp.exp(0.5 * z[:, half:]).astype(sigma_ref.dtype)


def vae_head(h, w, b):
    B, K = h.shape
    N = w.shape[1]
    tm = B if B <= 256 else 256
    return pl.pallas_call(
        _vae_head_kernel,
        out_shape=(jax.ShapeDtypeStruct((B, N // 2), jnp.float32),
                   jax.ShapeDtypeStruct((B, N // 2), jnp.float32)),
        grid=(pl.cdiv(B, tm),),
        in_specs=[
            pl.BlockSpec((tm, K), lambda i: (i, 0)),
            pl.BlockSpec((K, N), lambda i: (0, 0)),
            pl.BlockSpec((1, N), lambda i: (0, 0)),
        ],
        out_specs=(pl.BlockSpec((tm, N // 2), lambda i: (i, 0)),
                   pl.BlockSpec((tm, N // 2), lambda i: (i, 0))),
        compiler_params=pltpu.CompilerParams(
            dimension_semantics=("parallel",),
            vmem_limit_bytes=32 << 20),
        cost_estimate=pl.CostEstimate(
            flops=2 * B * K * N, transcendentals=B * (N // 2),
            bytes_accessed=B * K * 4 + K * N * 2 + N * 4 + B * N * 4),
    )(h, w, b)


# --------------------------------- JAX glue ----------------------------------
def _patch_index_tables():
    """Gather indices (4, 9, 256) into the 30x30 reflect-padded image.

    For pool-window corner q=(a,b) and padded pool-1 position (hp, wp) in
    [0,16)^2, column hp*16+wp and tap dy*3+dk pick the image pixel feeding the
    conv1 output at (2*reflect(hp-1)+a+dy, 2*reflect(wp-1)+b+dk): this bakes
    both maxpool1's window structure and conv2's reflect padding into the
    patch layout so the kernel never reshuffles spatially.
    """
    hp = np.arange(16)
    refl = np.where(hp - 1 < 0, 1, np.where(hp - 1 > 13, 12, hp - 1))
    par_a = np.array([0, 0, 1, 1])
    par_b = np.array([0, 1, 0, 1])
    d = np.arange(3)
    # axes: (q, dy, dk, hp, wp)
    rows = (2 * refl)[None, None, None, :, None] \
        + par_a[:, None, None, None, None] + d[None, :, None, None, None]
    cols = (2 * refl)[None, None, None, None, :] \
        + par_b[:, None, None, None, None] + d[None, None, :, None, None]
    rows, cols = np.broadcast_arrays(rows, cols)
    return (rows.reshape(4, 9, 256).astype(np.int32),
            cols.reshape(4, 9, 256).astype(np.int32))


_PATCH_ROWS, _PATCH_COLS = _patch_index_tables()


def _build_conv1_patches(x):
    """x: (B,1,28,28) -> (4, 9, B*256), tap axis on sublanes, batch*space on lanes."""
    B = x.shape[0]
    xp = jnp.pad(x[:, 0], ((0, 0), (1, 1), (1, 1)), mode="reflect")  # (B,30,30)
    b_idx = jnp.arange(B, dtype=jnp.int32)[None, None, :, None]
    patches = xp[b_idx, _PATCH_ROWS[:, :, None, :], _PATCH_COLS[:, :, None, :]]
    return patches.reshape(4, 9, B * 256)


def _build_pool2_select():
    # (205, 49) 0/1 matrix: column 7*h3+w3 picks row 32*h3+2*w3 of the zh slab.
    s = np.zeros((205, 49), np.float32)
    i = np.arange(49)
    s[32 * (i // 7) + 2 * (i % 7), i] = 1.0
    return jnp.asarray(s)


def encoder_features_from_x(x, params):
    B = x.shape[0]
    nb = _NB_MAX if B >= _NB_MAX else B
    bp = -(-B // nb) * nb
    if bp != B:                                   # pad batch to a multiple of NB
        x = jnp.pad(x, ((0, bp - B), (0, 0), (0, 0), (0, 0)))
    a1 = _build_conv1_patches(x)
    feats = encoder_features(a1, params["w1t"], params["b1"], params["w2t"],
                             params["b2"], params["s2t"], bp=bp, nb=nb)
    return feats[:B]                              # (B, 64, 49), torch (c,h,w) order


def encoder_forward(x, params):
    feats = encoder_features_from_x(x, params)
    h = feats.reshape(x.shape[0], 64 * 49)        # free reshape, torch flatten order
    return vae_head(h, params["w_head"], params["b_head"])


# ------------------------------ parameter setup ------------------------------
def convert_torch_params(conv1_w, conv1_b, conv2_w, conv2_b,
                         lin_mu_w, lin_mu_b, lin_lv_w, lin_lv_b):
    """Torch-layout weights -> kernel-friendly (channel-major) layouts."""
    w1t = conv1_w.reshape(32, 9)                                        # (cout, kh*3+kw)
    w2t = jnp.transpose(conv2_w, (2, 0, 3, 1)).reshape(3, 64, 96)       # (kh, cout, kw*32+cin)
    # Features come out in torch's (c,h,w) order -> merged head weight needs no permute.
    w_head = jnp.concatenate([lin_mu_w, lin_lv_w], axis=0).T.astype(jnp.bfloat16)
    b_head = jnp.concatenate([lin_mu_b, lin_lv_b]).reshape(1, 512)
    return {
        "w1t": w1t, "b1": conv1_b.reshape(32, 1),
        "w2t": w2t, "b2": conv2_b.reshape(64, 1),
        "s2t": _build_pool2_select(),
        "w_head": w_head, "b_head": b_head,
    }


def init_raw_params(key):
    ks = jax.random.split(key, 8)
    return (
        jax.random.normal(ks[0], (32, 1, 3, 3), jnp.float32) * 0.2,
        jax.random.normal(ks[1], (32,), jnp.float32) * 0.1,
        jax.random.normal(ks[2], (64, 32, 3, 3), jnp.float32) * 0.05,
        jax.random.normal(ks[3], (64,), jnp.float32) * 0.05,
        jax.random.normal(ks[4], (256, 49 * 64), jnp.float32) * 0.02,
        jax.random.normal(ks[5], (256,), jnp.float32) * 0.02,
        jax.random.normal(ks[6], (256, 49 * 64), jnp.float32) * 0.02,
        jax.random.normal(ks[7], (256,), jnp.float32) * 0.02,
    )


# ------------------------- pure-JAX reference (spec) --------------------------
def encoder_reference(x, raw):
    c1w, c1b, c2w, c2b, mw, mb, lw, lb = raw

    def conv_reflect(h, w, b):
        hp = jnp.pad(h, ((0, 0), (0, 0), (1, 1), (1, 1)), mode="reflect")
        h = jax.lax.conv_general_dilated(
            hp, w, (1, 1), "VALID", dimension_numbers=("NCHW", "OIHW", "NCHW"))
        return jax.nn.relu(h + b[None, :, None, None])

    def pool2x2(h):
        B, C, H, W = h.shape
        return h.reshape(B, C, H // 2, 2, W // 2, 2).max(axis=(3, 5))

    h = pool2x2(conv_reflect(x, c1w, c1b))
    h = pool2x2(conv_reflect(h, c2w, c2b))
    feats = h.reshape(x.shape[0], 64, 49)
    hf = h.reshape(x.shape[0], 49 * 64)
    mu = hf @ mw.T + mb
    sigma = jnp.exp(0.5 * (hf @ lw.T + lb))
    return mu, sigma, feats


if __name__ == "__main__":
    # The Linear layers require 49*64 flattened features -> 1-channel 28x28 input.
    key = jax.random.PRNGKey(0)
    kx, kp = jax.random.split(key)
    raw = init_raw_params(kp)
    params = convert_torch_params(*raw)
    x = jax.random.normal(kx, (2, 1, 28, 28), jnp.float32)

    feats = jax.jit(encoder_features_from_x)(x, params)
    mu, sigma = jax.jit(encoder_forward)(x, params)
    jax.block_until_ready((feats, mu, sigma))

    # Lock semantics against the pure-JAX reference (f32 conv path; bf16 head).
    mu_ref, sigma_ref, feats_ref = encoder_reference(x, raw)
    np.testing.assert_allclose(np.asarray(feats), np.asarray(feats_ref),
                               rtol=3e-2, atol=3e-2)
    np.testing.assert_allclose(np.asarray(mu), np.asarray(mu_ref),
                               rtol=5e-2, atol=5e-2)
    np.testing.assert_allclose(np.asarray(sigma), np.asarray(sigma_ref),
                               rtol=5e-2, atol=5e-2)

    assert mu.shape == (2, 256) and sigma.shape == (2, 256)
    assert bool(jnp.all(jnp.isfinite(mu)))
    assert bool(jnp.all(sigma > 0.0))
    print("KERNEL_OK")
</pallas_src>

<mosaic_0001>
module attributes {stable_mosaic.version = 11 : i64} {
  func.func @_encoder_features_kernel(%arg0: i32, %arg1: memref<4x9x512xf32, #tpu.memory_space<vmem>>, %arg2: memref<32x9xf32, #tpu.memory_space<vmem>>, %arg3: memref<32x1xf32, #tpu.memory_space<vmem>>, %arg4: memref<3x64x96xf32, #tpu.memory_space<vmem>>, %arg5: memref<64x1xf32, #tpu.memory_space<vmem>>, %arg6: memref<205x49xf32, #tpu.memory_space<vmem>>, %arg7: memref<2x64x49xf32, #tpu.memory_space<vmem>>, %arg8: memref<32x576xf32, #tpu.memory_space<vmem>>, %arg9: memref<96x544xf32, #tpu.memory_space<vmem>>, %arg10: memref<64x512xf32, #tpu.memory_space<vmem>>) attributes {dimension_semantics = [#tpu.dimension_semantics<parallel>], iteration_bounds = array<i64: 1>, scalar_prefetch = 0 : i64, scratch_operands = 3 : i64, tpu.core_type = #tpu.core_type<tc>, window_params = [{transform_indices = @transform_0, window_bounds = array<i64: 4, 9, 512>}, {pipeline_mode = #tpu.pipeline_mode<synchronous>, transform_indices = @transform_1, window_bounds = array<i64: 32, 9>}, {pipeline_mode = #tpu.pipeline_mode<synchronous>, transform_indices = @transform_2, window_bounds = array<i64: 32, 1>}, {pipeline_mode = #tpu.pipeline_mode<synchronous>, transform_indices = @transform_3, window_bounds = array<i64: 3, 64, 96>}, {pipeline_mode = #tpu.pipeline_mode<synchronous>, transform_indices = @transform_4, window_bounds = array<i64: 64, 1>}, {pipeline_mode = #tpu.pipeline_mode<synchronous>, transform_indices = @transform_5, window_bounds = array<i64: 205, 49>}, {transform_indices = @transform_6, window_bounds = array<i64: 2, 64, 49>}]} {
    %c0 = arith.constant 0 : index
    %c0_0 = arith.constant 0 : index
    %0 = vector.load %arg2[%c0, %c0_0] : memref<32x9xf32, #tpu.memory_space<vmem>>, vector<32x9xf32>
    %c0_1 = arith.constant 0 : index
    %c0_2 = arith.constant 0 : index
    %c0_3 = arith.constant 0 : index
    %1 = vector.load %arg1[%c0_1, %c0_2, %c0_3] : memref<4x9x512xf32, #tpu.memory_space<vmem>>, vector<1x9x512xf32>
    %2 = vector.shape_cast %1 : vector<1x9x512xf32> to vector<9x512xf32>
    %cst = arith.constant dense<0.000000e+00> : vector<32x512xf32>
    %3 = tpu.matmul %0, %2, %cst {dimension_numbers = #tpu.dot_dimension_numbers<[1], [0], [0], [1], [0, 0, 1, 1], [], []>} : vector<32x9xf32>, vector<9x512xf32>, vector<32x512xf32> -> vector<32x512xf32>
    %c0_4 = arith.constant 0 : index
    %c0_5 = arith.constant 0 : index
    %4 = vector.load %arg2[%c0_4, %c0_5] : memref<32x9xf32, #tpu.memory_space<vmem>>, vector<32x9xf32>
    %c1 = arith.constant 1 : index
    %c0_6 = arith.constant 0 : index
    %c0_7 = arith.constant 0 : index
    %5 = vector.load %arg1[%c1, %c0_6, %c0_7] : memref<4x9x512xf32, #tpu.memory_space<vmem>>, vector<1x9x512xf32>
    %6 = vector.shape_cast %5 : vector<1x9x512xf32> to vector<9x512xf32>
    %cst_8 = arith.constant dense<0.000000e+00> : vector<32x512xf32>
    %7 = tpu.matmul %4, %6, %cst_8 {dimension_numbers = #tpu.dot_dimension_numbers<[1], [0], [0], [1], [0, 0, 1, 1], [], []>} : vector<32x9xf32>, vector<9x512xf32>, vector<32x512xf32> -> vector<32x512xf32>
    %8 = arith.maximumf %3, %7 : vector<32x512xf32>
    %c0_9 = arith.constant 0 : index
    %c0_10 = arith.constant 0 : index
    %9 = vector.load %arg2[%c0_9, %c0_10] : memref<32x9xf32, #tpu.memory_space<vmem>>, vector<32x9xf32>
    %c2 = arith.constant 2 : index
    %c0_11 = arith.constant 0 : index
    %c0_12 = arith.constant 0 : index
    %10 = vector.load %arg1[%c2, %c0_11, %c0_12] : memref<4x9x512xf32, #tpu.memory_space<vmem>>, vector<1x9x512xf32>
    %11 = vector.shape_cast %10 : vector<1x9x512xf32> to vector<9x512xf32>
    %cst_13 = arith.constant dense<0.000000e+00> : vector<32x512xf32>
    %12 = tpu.matmul %9, %11, %cst_13 {dimension_numbers = #tpu.dot_dimension_numbers<[1], [0], [0], [1], [0, 0, 1, 1], [], []>} : vector<32x9xf32>, vector<9x512xf32>, vector<32x512xf32> -> vector<32x512xf32>
    %13 = arith.maximumf %8, %12 : vector<32x512xf32>
    %c0_14 = arith.constant 0 : index
    %c0_15 = arith.constant 0 : index
    %14 = vector.load %arg2[%c0_14, %c0_15] : memref<32x9xf32, #tpu.memory_space<vmem>>, vector<32x9xf32>
    %c3 = arith.constant 3 : index
    %c0_16 = arith.constant 0 : index
    %c0_17 = arith.constant 0 : index
    %15 = vector.load %arg1[%c3, %c0_16, %c0_17] : memref<4x9x512xf32, #tpu.memory_space<vmem>>, vector<1x9x512xf32>
    %16 = vector.shape_cast %15 : vector<1x9x512xf32> to vector<9x512xf32>
    %cst_18 = arith.constant dense<0.000000e+00> : vector<32x512xf32>
    %17 = tpu.matmul %14, %16, %cst_18 {dimension_numbers = #tpu.dot_dimension_numbers<[1], [0], [0], [1], [0, 0, 1, 1], [], []>} : vector<32x9xf32>, vector<9x512xf32>, vector<32x512xf32> -> vector<32x512xf32>
    %18 = arith.maximumf %13, %17 : vector<32x512xf32>
    %c0_19 = arith.constant 0 : index
    %c0_20 = arith.constant 0 : index
    %19 = vector.load %arg3[%c0_19, %c0_20] : memref<32x1xf32, #tpu.memory_space<vmem>>, vector<32x1xf32>
    %20 = vector.broadcast %19 : vector<32x1xf32> to vector<32x512xf32>
    %21 = arith.addf %18, %20 : vector<32x512xf32>
    %cst_21 = arith.constant 0.000000e+00 : f32
    %22 = vector.broadcast %cst_21 : f32 to vector<32x512xf32>
    %23 = arith.maximumf %21, %22 : vector<32x512xf32>
    %c0_22 = arith.constant 0 : index
    %c0_23 = arith.constant 0 : index
    %24 = vector.load %arg8[%c0_22, %c0_23] : memref<32x576xf32, #tpu.memory_space<vmem>>, vector<32x512xf32>
    tpu.vector_store %arg8[%c0_22, %c0_23], %23 {strides = array<i32>} : memref<32x576xf32, #tpu.memory_space<vmem>>, vector<32x512xf32>,
    %cst_24 = arith.constant 0.000000e+00 : f32
    %25 = vector.broadcast %cst_24 : f32 to vector<32x64xf32>
    %c0_25 = arith.constant 0 : index
    %c512 = arith.constant 512 : index
    %26 = vector.load %arg8[%c0_25, %c512] : memref<32x576xf32, #tpu.memory_space<vmem>>, vector<32x64xf32>
    tpu.vector_store %arg8[%c0_25, %c512], %25 {strides = array<i32>} : memref<32x576xf32, #tpu.memory_space<vmem>>, vector<32x64xf32>,
    %c0_26 = arith.constant 0 : index
    %c0_27 = arith.constant 0 : index
    %27 = vector.load %arg8[%c0_26, %c0_27] : memref<32x576xf32, #tpu.memory_space<vmem>>, vector<32x544xf32>
    %c0_28 = arith.constant 0 : index
    %c0_29 = arith.constant 0 : index
    %28 = vector.load %arg9[%c0_28, %c0_29] : memref<96x544xf32, #tpu.memory_space<vmem>>, vector<32x544xf32>
    tpu.vector_store %arg9[%c0_28, %c0_29], %27 {strides = array<i32>} : memref<96x544xf32, #tpu.memory_space<vmem>>, vector<32x544xf32>,
    %c0_30 = arith.constant 0 : index
    %c1_31 = arith.constant 1 : index
    %29 = vector.load %arg8[%c0_30, %c1_31] : memref<32x576xf32, #tpu.memory_space<vmem>>, vector<32x544xf32>
    %c32 = arith.constant 32 : index
    %c0_32 = arith.constant 0 : index
    %30 = vector.load %arg9[%c32, %c0_32] : memref<96x544xf32, #tpu.memory_space<vmem>>, vector<32x544xf32>
    tpu.vector_store %arg9[%c32, %c0_32], %29 {strides = array<i32>} : memref<96x544xf32, #tpu.memory_space<vmem>>, vector<32x544xf32>,
    %c0_33 = arith.constant 0 : index
    %c2_34 = arith.constant 2 : index
    %31 = vector.load %arg8[%c0_33, %c2_34] : memref<32x576xf32, #tpu.memory_space<vmem>>, vector<32x544xf32>
    %c64 = arith.constant 64 : index
    %c0_35 = arith.constant 0 : index
    %32 = vector.load %arg9[%c64, %c0_35] : memref<96x544xf32, #tpu.memory_space<vmem>>, vector<32x544xf32>
    tpu.vector_store %arg9[%c64, %c0_35], %31 {strides = array<i32>} : memref<96x544xf32, #tpu.memory_space<vmem>>, vector<32x544xf32>,
    %c0_36 = arith.constant 0 : index
    %c0_37 = arith.constant 0 : index
    %c0_38 = arith.constant 0 : index
    %33 = vector.load %arg4[%c0_36, %c0_37, %c0_38] : memref<3x64x96xf32, #tpu.memory_space<vmem>>, vector<1x64x96xf32>
    %34 = vector.shape_cast %33 : vector<1x64x96xf32> to vector<64x96xf32>
    %c0_39 = arith.constant 0 : index
    %c0_40 = arith.constant 0 : index
    %35 = vector.load %arg9[%c0_39, %c0_40] : memref<96x544xf32, #tpu.memory_space<vmem>>, vector<96x512xf32>
    %cst_41 = arith.constant dense<0.000000e+00> : vector<64x512xf32>
    %36 = tpu.matmul %34, %35, %cst_41 {dimension_numbers = #tpu.dot_dimension_numbers<[1], [0], [0], [1], [0, 0, 1, 1], [], []>} : vector<64x96xf32>, vector<96x512xf32>, vector<64x512xf32> -> vector<64x512xf32>
    %c1_42 = arith.constant 1 : index
    %c0_43 = arith.constant 0 : index
    %c0_44 = arith.constant 0 : index
    %37 = vector.load %arg4[%c1_42, %c0_43, %c0_44] : memref<3x64x96xf32, #tpu.memory_space<vmem>>, vector<1x64x96xf32>
    %38 = vector.shape_cast %37 : vector<1x64x96xf32> to vector<64x96xf32>
    %c0_45 = arith.constant 0 : index
    %c16 = arith.constant 16 : index
    %39 = vector.load %arg9[%c0_45, %c16] : memref<96x544xf32, #tpu.memory_space<vmem>>, vector<96x512xf32>
    %cst_46 = arith.constant dense<0.000000e+00> : vector<64x512xf32>
    %40 = tpu.matmul %38, %39, %cst_46 {dimension_numbers = #tpu.dot_dimension_numbers<[1], [0], [0], [1], [0, 0, 1, 1], [], []>} : vector<64x96xf32>, vector<96x512xf32>, vector<64x512xf32> -> vector<64x512xf32>
    %41 = arith.addf %36, %40 : vector<64x512xf32>
    %c2_47 = arith.constant 2 : index
    %c0_48 = arith.constant 0 : index
    %c0_49 = arith.constant 0 : index
    %42 = vector.load %arg4[%c2_47, %c0_48, %c0_49] : memref<3x64x96xf32, #tpu.memory_space<vmem>>, vector<1x64x96xf32>
    %43 = vector.shape_cast %42 : vector<1x64x96xf32> to vector<64x96xf32>
    %c0_50 = arith.constant 0 : index
    %c32_51 = arith.constant 32 : index
    %44 = vector.load %arg9[%c0_50, %c32_51] : memref<96x544xf32, #tpu.memory_space<vmem>>, vector<96x512xf32>
    %cst_52 = arith.constant dense<0.000000e+00> : vector<64x512xf32>
    %45 = tpu.matmul %43, %44, %cst_52 {dimension_numbers = #tpu.dot_dimension_numbers<[1], [0], [0], [1], [0, 0, 1, 1], [], []>} : vector<64x96xf32>, vector<96x512xf32>, vector<64x512xf32> -> vector<64x512xf32>
    %46 = arith.addf %41, %45 : vector<64x512xf32>
    %c0_53 = arith.constant 0 : index
    %c0_54 = arith.constant 0 : index
    %47 = vector.load %arg5[%c0_53, %c0_54] : memref<64x1xf32, #tpu.memory_space<vmem>>, vector<64x1xf32>
    %48 = vector.broadcast %47 : vector<64x1xf32> to vector<64x512xf32>
    %49 = arith.addf %46, %48 : vector<64x512xf32>
    %cst_55 = arith.constant 0.000000e+00 : f32
    %50 = vector.broadcast %cst_55 : f32 to vector<64x512xf32>
    %51 = arith.maximumf %49, %50 : vector<64x512xf32>
    %c0_56 = arith.constant 0 : index
    %c0_57 = arith.constant 0 : index
    %52 = vector.load %arg10[%c0_56, %c0_57] : memref<64x512xf32, #tpu.memory_space<vmem>>, vector<64x512xf32>
    tpu.vector_store %arg10[%c0_56, %c0_57], %51 {strides = array<i32>} : memref<64x512xf32, #tpu.memory_space<vmem>>, vector<64x512xf32>,
    %c0_58 = arith.constant 0 : index
    %c0_59 = arith.constant 0 : index
    %53 = vector.load %arg10[%c0_58, %c0_59] : memref<64x512xf32, #tpu.memory_space<vmem>>, vector<64x496xf32>
    %c0_60 = arith.constant 0 : index
    %c16_61 = arith.constant 16 : index
    %54 = vector.load %arg10[%c0_60, %c16_61] : memref<64x512xf32, #tpu.memory_space<vmem>>, vector<64x496xf32>
    %55 = arith.maximumf %53, %54 : vector<64x496xf32>
    %56 = vector.extract_strided_slice %55 {offsets = [0, 0], sizes = [64, 495], strides = [1, 1]} : vector<64x496xf32> to vector<64x495xf32>
    %57 = vector.extract_strided_slice %55 {offsets = [0, 1], sizes = [64, 495], strides = [1, 1]} : vector<64x496xf32> to vector<64x495xf32>
    %58 = arith.maximumf %56, %57 : vector<64x495xf32>
    %59 = vector.extract_strided_slice %58 {offsets = [0, 0], sizes = [64, 205], strides = [1, 1]} : vector<64x495xf32> to vector<64x205xf32>
    %c0_62 = arith.constant 0 : index
    %c0_63 = arith.constant 0 : index
    %60 = vector.load %arg6[%c0_62, %c0_63] : memref<205x49xf32, #tpu.memory_space<vmem>>, vector<205x49xf32>
    %cst_64 = arith.constant dense<0.000000e+00> : vector<64x49xf32>
    %61 = tpu.matmul %59, %60, %cst_64 {dimension_numbers = #tpu.dot_dimension_numbers<[1], [0], [0], [1], [0, 0, 1, 1], [], []>} : vector<64x205xf32>, vector<205x49xf32>, vector<64x49xf32> -> vector<64x49xf32>
    %c0_65 = arith.constant 0 : index
    %c0_66 = arith.constant 0 : index
    %c0_67 = arith.constant 0 : index
    %62 = vector.load %arg7[%c0_65, %c0_66, %c0_67] : memref<2x64x49xf32, #tpu.memory_space<vmem>>, vector<1x64x49xf32>
    %63 = vector.shape_cast %62 : vector<1x64x49xf32> to vector<64x49xf32>
    %64 = vector.shape_cast %61 : vector<64x49xf32> to vector<1x64x49xf32>
    tpu.vector_store %arg7[%c0_65, %c0_66, %c0_67], %64 {strides = array<i32>} : memref<2x64x49xf32, #tpu.memory_space<vmem>>, vector<1x64x49xf32>,
    %65 = vector.extract_strided_slice %58 {offsets = [0, 256], sizes = [64, 205], strides = [1, 1]} : vector<64x495xf32> to vector<64x205xf32>
    %c0_68 = arith.constant 0 : index
    %c0_69 = arith.constant 0 : index
    %66 = vector.load %arg6[%c0_68, %c0_69] : memref<205x49xf32, #tpu.memory_space<vmem>>, vector<205x49xf32>
    %cst_70 = arith.constant dense<0.000000e+00> : vector<64x49xf32>
    %67 = tpu.matmul %65, %66, %cst_70 {dimension_numbers = #tpu.dot_dimension_numbers<[1], [0], [0], [1], [0, 0, 1, 1], [], []>} : vector<64x205xf32>, vector<205x49xf32>, vector<64x49xf32> -> vector<64x49xf32>
    %c1_71 = arith.constant 1 : index
    %c0_72 = arith.constant 0 : index
    %c0_73 = arith.constant 0 : index
    %68 = vector.load %arg7[%c1_71, %c0_72, %c0_73] : memref<2x64x49xf32, #tpu.memory_space<vmem>>, vector<1x64x49xf32>
    %69 = vector.shape_cast %68 : vector<1x64x49xf32> to vector<64x49xf32>
    %70 = vector.shape_cast %67 : vector<64x49xf32> to vector<1x64x49xf32>
    tpu.vector_store %arg7[%c1_71, %c0_72, %c0_73], %70 {strides = array<i32>} : memref<2x64x49xf32, #tpu.memory_space<vmem>>, vector<1x64x49xf32>,
    return
  }
  func.func @transform_0(%arg0: i32) -> (i32, i32, i32) {
    %c0_i32 = arith.constant 0 : i32
    %c0_i32_0 = arith.constant 0 : i32
    %c0_i32_1 = arith.constant 0 : i32
    return %c0_i32, %c0_i32_0, %arg0 : i32, i32, i32
  }
  func.func @transform_1(%arg0: i32) -> (i32, i32) {
    %c0_i32 = arith.constant 0 : i32
    %c0_i32_0 = arith.constant 0 : i32
    %c0_i32_1 = arith.constant 0 : i32
    return %c0_i32, %c0_i32_0 : i32, i32
  }
  func.func @transform_2(%arg0: i32) -> (i32, i32) {
    %c0_i32 = arith.constant 0 : i32
    %c0_i32_0 = arith.constant 0 : i32
    %c0_i32_1 = arith.constant 0 : i32
    return %c0_i32, %c0_i32_0 : i32, i32
  }
  func.func @transform_3(%arg0: i32) -> (i32, i32, i32) {
    %c0_i32 = arith.constant 0 : i32
    %c0_i32_0 = arith.constant 0 : i32
    %c0_i32_1 = arith.constant 0 : i32
    %c0_i32_2 = arith.constant 0 : i32
    return %c0_i32, %c0_i32_0, %c0_i32_1 : i32, i32, i32
  }
  func.func @transform_4(%arg0: i32) -> (i32, i32) {
    %c0_i32 = arith.constant 0 : i32
    %c0_i32_0 = arith.constant 0 : i32
    %c0_i32_1 = arith.constant 0 : i32
    return %c0_i32, %c0_i32_0 : i32, i32
  }
  func.func @transform_5(%arg0: i32) -> (i32, i32) {
    %c0_i32 = arith.constant 0 : i32
    %c0_i32_0 = arith.constant 0 : i32
    %c0_i32_1 = arith.constant 0 : i32
    return %c0_i32, %c0_i32_0 : i32, i32
  }
  func.func @transform_6(%arg0: i32) -> (i32, i32, i32) {
    %c0_i32 = arith.constant 0 : i32
    %c0_i32_0 = arith.constant 0 : i32
    %c0_i32_1 = arith.constant 0 : i32
    return %arg0, %c0_i32, %c0_i32_0 : i32, i32, i32
  }
}

</mosaic_0001>

<bundles_post_ra>
// kernel: encoder_features_from_x.1
= control target key start
LH: loop header
LB: loop body
LE: loop exit
PB: predicated region body
PF: predicated region fallthrough
CT: control target
= control target key end

     0   :  { %vm48_vm0 = vcmask 1040384   ;;  %vm4365_vm1 = vmmov 1   ;;  %v6423_v3 = vmov 0.0   ;;  %v4367_v8 = vmov 0   ;;  %s4369_s27 = smov 126   ;;  %s4370_s28 = smov 112   ;;  %s6416_s0 = inlined_call_operand.vmem [shape: f32[4,9,512], index: 0, kind: input, shape index: {}]   ;;  %s6417_s1 = inlined_call_operand.vmem [shape: f32[32,9], index: 1, kind: input, shape index: {}]   ;;  %s6418_s2 = inlined_call_operand.vmem [shape: f32[32,1], index: 2, kind: input, shape index: {}]   ;;  %s6419_s4 = inlined_call_operand.vmem [shape: f32[64,1], index: 4, kind: input, shape index: {}]   ;;  %s6420_s3 = inlined_call_operand.vmem [shape: f32[3,64,96], index: 3, kind: input, shape index: {}]   ;;  %s6421_s5 = inlined_call_operand.vmem [shape: f32[205,49], index: 5, kind: input, shape index: {}]   ;;  %s6422_s6 = inlined_call_operand.vmem [shape: f32[2,64,49], index: 6, kind: output, shape index: {}]  }
   0x1   :  { %v28_v0 = vld [vmem:[%s6416_s0 + $0x8] sm:$0xff]  ;;  %vm4415_vm2 = vmpackc.low %vm48_vm0, %vm4365_vm1  ;;  %125 = vmatprep.mubr.f32.mxu0 %v6423_v3  ;;  %214 = vmatprep.mubr.f32.mxu1 %v6423_v3  ;;  %v30_v5 = vld [vmem:[%s6416_s0 + $0x18] sm:$0xff]  ;;  %vm35_vm3 = vcmask 72704   ;;  %vm956_vm4 = vcmask 523264   ;;  %vm985_vm5 = vcmask 261120   ;;  %vm1082_vm6 = vcmask 1039360  }
   0x2   :  { %v32_v1 = vld [vmem:[%s6416_s0 + $0x28] sm:$0x1]  ;;  %v34_v6 = vld [vmem:[%s6416_s0 + $0x38] sm:$0x1]  ;;  %v27_v7 = vld [vmem:[%s6416_s0] sm:$0xff]  ;;  %4028 = vset.pattern.permute.xlu0 %v4367_v8  ;;  %4029 = vset.pattern.permute.xlu1 %v4367_v8  ;;  %957 = vst.msk [vmem:[#allocation2 + $0x20] sm:$0xff] %vm956_vm4, %v6423_v3 }
   0x3   :  { %v3684_v4 = vpack.c.bf16 %v32_v1, %v28_v0  ;;  %v3690_v9 = vpack.c.bf16 %v34_v6, %v30_v5  ;;  %v31_v10 = vld [vmem:[%s6416_s0 + $0x20] sm:$0x1]  ;;  %v29_v11 = vld [vmem:[%s6416_s0 + $0x10] sm:$0xff]  ;;  %v3535_v15 = vld [vmem:[%s6416_s0 + $0x48] sm:$0xff]  ;;  %958 = vst.msk [vmem:[#allocation2 + $0x48] sm:$0xff] %vm956_vm4, %v6423_v3  ;;  %vm1219_vm7 = vcmask 1031168  }
   0x4   :  { %v33_v12 = vld [vmem:[%s6416_s0 + $0x30] sm:$0x1]  ;;  %v3687_v13 = vpack.c.bf16 %v31_v10, %v27_v7  ;;  %v3539_v16 = vld [vmem:[%s6416_s0 + $0x68] sm:$0x1]  ;;  %v3534_v18 = vld [vmem:[%s6416_s0 + $0x40] sm:$0xff]  ;;  %959 = vst.msk [vmem:[#allocation2 + $0x70] sm:$0xff] %vm956_vm4, %v6423_v3 }
   0x5   :  { %3686 = vmatprep.subr.msk.bf16.mxu0 %vm4415_vm2, %v3684_v4  ;;  %v3693_v14 = vpack.c.bf16 %v33_v12, %v29_v11  ;;  %3692 = vmatprep.subr.msk.bf16.mxu1 %vm4415_vm2, %v3690_v9  ;;  %v3696_v17 = vpack.c.bf16 %v3539_v16, %v3535_v15  ;;  %v3538_v19 = vld [vmem:[%s6416_s0 + $0x60] sm:$0x1]  ;;  %v3537_v22 = vld [vmem:[%s6416_s0 + $0x58] sm:$0xff]  ;;  %v3536_v25 = vld [vmem:[%s6416_s0 + $0x50] sm:$0xff]  ;;  %960 = vst.msk [vmem:[#allocation2 + $0x98] sm:$0xff] %vm956_vm4, %v6423_v3  ;;  %vm1533_vm8 = vcmask 916480  }
   0x6   :  { %3689 = vmatpush1.bf16.msk.msra.mxu0 %vm4415_vm2, %v3687_v13  ;;  %v4462_v20 = vld [vmem:[%s6417_s1] sm:$0xff]  ;;  %v3699_v21 = vpack.c.bf16 %v3538_v19, %v3534_v18  ;;  %v3541_v23 = vld [vmem:[%s6416_s0 + $0x78] sm:$0x1]  ;;  %v3540_v26 = vld [vmem:[%s6416_s0 + $0x70] sm:$0x1]  ;;  %s4371_s29 = smov 96  }
   0x7   :  { %3695 = vmatpush1.bf16.msk.msra.mxu1 %vm4415_vm2, %v3693_v14  ;;  %3698 = vmatprep.subr.msk.bf16.mxu0 %vm4415_vm2, %v3696_v17  ;;  %v3702_v24 = vpack.c.bf16 %v3541_v23, %v3537_v22  ;;  %v3705_v27 = vpack.c.bf16 %v3540_v26, %v3536_v25  ;;  %v3555_v28 = vld [vmem:[%s6416_s0 + $0x88] sm:$0xff]  ;;  %v3557_v31 = vld [vmem:[%s6416_s0 + $0x98] sm:$0xff]  ;;  %v884_v35 = vld [vmem:[%s6418_s2] sm:$0xff]  ;;  %vm1630_vm9 = vcmask 785408   ;;  %vm3233_vm10 = vcmask 1044480  }
   0x8   :  { %v3559_v29 = vld [vmem:[%s6416_s0 + $0xa8] sm:$0x1]  ;;  %v3561_v32 = vld [vmem:[%s6416_s0 + $0xb8] sm:$0x1]  ;;  %v4521_v36 = vld [vmem:[%s6417_s1 + $0x10] sm:$0xff]  ;;  %890 = vperm.xlu0 %4028, %v884_v35   ;;  %vm3208_vm12 = vcmask 629760  }
   0x9   :  { %3524 = vmatmul.mubr.msk.f32.vlgmr.msra.gmra.mrb[0].mxu0 %vm35_vm3, %v4462_v20  ;;  %v3708_v30 = vpack.c.bf16 %v3559_v29, %v3555_v28  ;;  %v4500_v33 = vld [vmem:[%s6417_s1 + $0x8] sm:$0xff]  ;;  %3704 = vmatprep.subr.msk.bf16.mxu1 %vm4415_vm2, %v3702_v24  ;;  %v3714_v34 = vpack.c.bf16 %v3561_v32, %v3557_v31  ;;  %v886_v37 = vld [vmem:[%s6418_s2 + $0x10] sm:$0xff]  ;;  %v887_v39 = vld [vmem:[%s6418_s2 + $0x18] sm:$0xff]  ;;  %vm3342_vm13 = vcmask 400384  }
   0xa   :  { %3530 = vmatmul.mubr.msk.f32.vlgmr.msra.gmra.mrb[0].mxu1 %vm35_vm3, %v4462_v20  ;;  %3701 = vmatpush1.bf16.msk.msra.mxu0 %vm4415_vm2, %v3699_v21  ;;  %v885_v38 = vld [vmem:[%s6418_s2 + $0x8] sm:$0xff]  ;;  %v4543_v40 = vld [vmem:[%s6417_s1 + $0x18] sm:$0xff]  ;;  %v3554_v41 = vld [vmem:[%s6416_s0 + $0x80] sm:$0xff] }
   0xb   :  { %131 = vmatprep.mubr.f32.mxu0 %v6423_v3  ;;  %220 = vmatprep.mubr.f32.mxu1 %v6423_v3  ;;  %v3558_v42 = vld [vmem:[%s6416_s0 + $0xa0] sm:$0x1]  ;;  %v3556_v43 = vld [vmem:[%s6416_s0 + $0x90] sm:$0xff]  ;;  %v3575_v45 = vld [vmem:[%s6416_s0 + $0xc8] sm:$0xff] }
   0xc   :  { %3707 = vmatpush1.bf16.msk.msra.mxu1 %vm4415_vm2, %v3705_v27  ;;  %3710 = vmatprep.subr.msk.bf16.mxu0 %vm4415_vm2, %v3708_v30  ;;  %v3560_v44 = vld [vmem:[%s6416_s0 + $0xb0] sm:$0x1]  ;;  %v3579_v46 = vld [vmem:[%s6416_s0 + $0xe8] sm:$0x1]  ;;  %v3577_v47 = vld [vmem:[%s6416_s0 + $0xd8] sm:$0xff]  ;;  %v3711_v49 = vpack.c.bf16 %v3558_v42, %v3554_v41 }
   0xd   :  { %3525 = vmatmul.mubr.msk.f32.gmra.mrb[2].mxu0 %vm35_vm3, %v4500_v33  ;;  %3716 = vmatprep.subr.msk.bf16.mxu1 %vm4415_vm2, %v3714_v34  ;;  %v3581_v48 = vld [vmem:[%s6416_s0 + $0xf8] sm:$0x1]  ;;  %v3717_v50 = vpack.c.bf16 %v3560_v44, %v3556_v43  ;;  %v3720_v51 = vpack.c.bf16 %v3579_v46, %v3575_v45  ;;  %v3574_v53 = vld [vmem:[%s6416_s0 + $0xc0] sm:$0xff]  ;;  %v3576_v55 = vld [vmem:[%s6416_s0 + $0xd0] sm:$0xff] }
   0xe   :  { %3531 = vmatmul.mubr.msk.f32.gmra.mrb[2].mxu1 %vm35_vm3, %v4500_v33  ;;  %137 = vmatprep.mubr.f32.mxu0 %v6423_v3  ;;  %v3726_v52 = vpack.c.bf16 %v3581_v48, %v3577_v47  ;;  %v3578_v54 = vld [vmem:[%s6416_s0 + $0xe0] sm:$0x1]  ;;  %v3580_v56 = vld [vmem:[%s6416_s0 + $0xf0] sm:$0x1]  ;;  %s4368_s0 = smov 127   ;;  %v1011_v60 = vld [vmem:[#allocation2 + $0x48] sm:$0xff] }
   0xf   :  { %226 = vmatprep.mubr.f32.mxu1 %v6423_v3  ;;  %900 = vperm.xlu1 %4029, %v886_v37   ;;  %v3723_v57 = vpack.c.bf16 %v3578_v54, %v3574_v53  ;;  %v3729_v58 = vpack.c.bf16 %v3580_v56, %v3576_v55  ;;  %v1006_v59 = vld [vmem:[#allocation2 + $0x20] sm:$0xff]  ;;  %v1016_v61 = vld [vmem:[#allocation2 + $0x70] sm:$0xff]  ;;  %v1021_v62 = vld [vmem:[#allocation2 + $0x98] sm:$0xff]  ;;  %991 = vst.msk [vmem:[#allocation3 + $0x48] sm:$0xff] %vm985_vm5, %v1011_v60 }
  0x10   :  { %895 = vperm.xlu0 %4028, %v885_v38   ;;  %986 = vst.msk [vmem:[#allocation3 + $0x20] sm:$0xff] %vm985_vm5, %v1006_v59  ;;  %996 = vst.msk [vmem:[#allocation3 + $0x70] sm:$0xff] %vm985_vm5, %v1016_v61 }
  0x11   :  { %3526 = vmatmul.mubr.msk.f32.gmra.mrb[4].mxu0 %vm35_vm3, %v4521_v36  ;;  %1001 = vst.msk [vmem:[#allocation3 + $0x98] sm:$0xff] %vm985_vm5, %v1021_v62  ;;  %vm6056_vm11 = vmpackc.low %vm3233_vm10, %vm4365_vm1 }
  0x12   :  { %3532 = vmatmul.mubr.msk.f32.gmra.mrb[4].mxu1 %vm35_vm3, %v4521_v36  ;;  %143 = vmatprep.mubr.f32.mxu0 %v6423_v3 }
  0x13   :  { %232 = vmatprep.mubr.f32.mxu1 %v6423_v3  ;;  %905 = vperm.xlu1 %4029, %v887_v39  }
  0x15   :  { %3527 = vmatmul.mubr.msk.f32.gmra.mrb[6].mxu0 %vm35_vm3, %v4543_v40 }
  0x16   :  { %3533 = vmatmul.mubr.msk.f32.gmra.mrb[6].mxu1 %vm35_vm3, %v4543_v40  ;;  %324 = vmatprep.mubr.f32.mxu0 %v6423_v3 }
  0x17   :  { %413 = vmatprep.mubr.f32.mxu1 %v6423_v3  ;;  %1050 = vrot.lane.b32.xlu1 %v1006_v59, %s4368_s0 }
  0x19   :  { %3544 = vmatmul.mubr.msk.f32.vlgmr.msra.gmra.mrb[8].mxu0 %vm35_vm3, %v4462_v20 }
  0x1a   :  { %3550 = vmatmul.mubr.msk.f32.vlgmr.msra.gmra.mrb[8].mxu1 %vm35_vm3, %v4462_v20  ;;  %3713 = vmatpush1.bf16.msk.msra.mxu0 %vm4415_vm2, %v3711_v49 }
  0x1b   :  { %330 = vmatprep.mubr.f32.mxu0 %v6423_v3  ;;  %419 = vmatprep.mubr.f32.mxu1 %v6423_v3 }
  0x1c   :  { %3719 = vmatpush1.bf16.msk.msra.mxu1 %vm4415_vm2, %v3717_v50  ;;  %3722 = vmatprep.subr.msk.bf16.mxu0 %vm4415_vm2, %v3720_v51 }
  0x1d   :  { %3728 = vmatprep.subr.msk.bf16.mxu1 %vm4415_vm2, %v3726_v52  ;;  %3545 = vmatmul.mubr.msk.f32.gmra.mrb[10].mxu0 %vm35_vm3, %v4500_v33 }
  0x1e   :  { %3551 = vmatmul.mubr.msk.f32.gmra.mrb[10].mxu1 %vm35_vm3, %v4500_v33  ;;  %336 = vmatprep.mubr.f32.mxu0 %v6423_v3 }
  0x1f   :  { %425 = vmatprep.mubr.f32.mxu1 %v6423_v3  ;;  %1060 = vrot.lane.b32.xlu1 %v1011_v60, %s4368_s0 }
  0x21   :  { %3546 = vmatmul.mubr.msk.f32.gmra.mrb[12].mxu0 %vm35_vm3, %v4521_v36 }
  0x22   :  { %3552 = vmatmul.mubr.msk.f32.gmra.mrb[12].mxu1 %vm35_vm3, %v4521_v36  ;;  %342 = vmatprep.mubr.f32.mxu0 %v6423_v3 }
  0x23   :  { %431 = vmatprep.mubr.f32.mxu1 %v6423_v3  ;;  %1070 = vrot.lane.b32.xlu1 %v1016_v61, %s4368_s0 }
  0x25   :  { %3547 = vmatmul.mubr.msk.f32.gmra.mrb[14].mxu0 %vm35_vm3, %v4543_v40 }
  0x26   :  { %3553 = vmatmul.mubr.msk.f32.gmra.mrb[14].mxu1 %vm35_vm3, %v4543_v40  ;;  %539 = vmatprep.mubr.f32.mxu0 %v6423_v3 }
  0x27   :  { %628 = vmatprep.mubr.f32.mxu1 %v6423_v3  ;;  %1080 = vrot.lane.b32.xlu1 %v1021_v62, %s4368_s0 }
  0x29   :  { %3564 = vmatmul.mubr.msk.f32.vlgmr.msra.gmra.mrb[16].mxu0 %vm35_vm3, %v4462_v20 }
  0x2a   :  { %3570 = vmatmul.mubr.msk.f32.vlgmr.msra.gmra.mrb[16].mxu1 %vm35_vm3, %v4462_v20  ;;  %3725 = vmatpush1.bf16.msk.msra.mxu0 %vm4415_vm2, %v3723_v57 }
  0x2b   :  { %545 = vmatprep.mubr.f32.mxu0 %v6423_v3  ;;  %634 = vmatprep.mubr.f32.mxu1 %v6423_v3 }
  0x2c   :  { %3731 = vmatpush1.bf16.msk.msra.mxu1 %vm4415_vm2, %v3729_v58  ;;  %1187 = vrot.lane.b32.xlu1 %v1006_v59, %s4369_s27 }
  0x2d   :  { %3565 = vmatmul.mubr.msk.f32.gmra.mrb[18].mxu0 %vm35_vm3, %v4500_v33 }
  0x2e   :  { %3571 = vmatmul.mubr.msk.f32.gmra.mrb[18].mxu1 %vm35_vm3, %v4500_v33  ;;  %551 = vmatprep.mubr.f32.mxu0 %v6423_v3 }
  0x2f   :  { %640 = vmatprep.mubr.f32.mxu1 %v6423_v3 }
  0x30   :  { %1197 = vrot.lane.b32.xlu1 %v1011_v60, %s4369_s27 }
  0x31   :  { %3566 = vmatmul.mubr.msk.f32.gmra.mrb[20].mxu0 %vm35_vm3, %v4521_v36 }
  0x32   :  { %3572 = vmatmul.mubr.msk.f32.gmra.mrb[20].mxu1 %vm35_vm3, %v4521_v36  ;;  %557 = vmatprep.mubr.f32.mxu0 %v6423_v3 }
  0x33   :  { %646 = vmatprep.mubr.f32.mxu1 %v6423_v3 }
  0x34   :  { %1207 = vrot.lane.b32.xlu1 %v1016_v61, %s4369_s27 }
  0x35   :  { %3567 = vmatmul.mubr.msk.f32.gmra.mrb[22].mxu0 %vm35_vm3, %v4543_v40 }
  0x36   :  { %3573 = vmatmul.mubr.msk.f32.gmra.mrb[22].mxu1 %vm35_vm3, %v4543_v40  ;;  %754 = vmatprep.mubr.f32.mxu0 %v6423_v3 }
  0x37   :  { %843 = vmatprep.mubr.f32.mxu1 %v6423_v3 }
  0x38   :  { %1217 = vrot.lane.b32.xlu1 %v1021_v62, %s4369_s27 }
  0x39   :  { %3584 = vmatmul.mubr.msk.f32.vlgmr.msra.gmra.mrb[24].mxu0 %vm35_vm3, %v4462_v20 }
  0x3a   :  { %3590 = vmatmul.mubr.msk.f32.vlgmr.msra.gmra.mrb[24].mxu1 %vm35_vm3, %v4462_v20  ;;  %760 = vmatprep.mubr.f32.mxu0 %v6423_v3 }
  0x3b   :  { %849 = vmatprep.mubr.f32.mxu1 %v6423_v3 }
  0x3d   :  { %3585 = vmatmul.mubr.msk.f32.gmra.mrb[26].mxu0 %vm35_vm3, %v4500_v33 }
  0x3e   :  { %3591 = vmatmul.mubr.msk.f32.gmra.mrb[26].mxu1 %vm35_vm3, %v4500_v33  ;;  %766 = vmatprep.mubr.f32.mxu0 %v6423_v3 }
  0x3f   :  { %855 = vmatprep.mubr.f32.mxu1 %v6423_v3 }
  0x41   :  { %3586 = vmatmul.mubr.msk.f32.gmra.mrb[28].mxu0 %vm35_vm3, %v4521_v36 }
  0x42   :  { %3592 = vmatmul.mubr.msk.f32.gmra.mrb[28].mxu1 %vm35_vm3, %v4521_v36  ;;  %772 = vmatprep.mubr.f32.mxu0 %v6423_v3 }
  0x43   :  { %861 = vmatprep.mubr.f32.mxu1 %v6423_v3 }
  0x45   :  { %3587 = vmatmul.mubr.msk.f32.gmra.mrb[30].mxu0 %vm35_vm3, %v4543_v40 }
  0x46   :  { %3593 = vmatmul.mubr.msk.f32.gmra.mrb[30].mxu1 %vm35_vm3, %v4543_v40  ;;  %1719 = vmatprep.mubr.f32.mxu0 %v6423_v3 }
  0x47   :  { %1832 = vmatprep.mubr.f32.mxu1 %v6423_v3 }
  0x8e   :  { %v4687_v63 = vpop.permute.xlu1 %900 }
  0x92   :  { %v4705_v9 = vpop.permute.xlu1 %905 }
  0x96   :  { %v4715_v14 = vpop.permute.xlu1 %1050 }
  0x97   :  { %1123 = vst.msk [vmem:[#allocation3 + $0xc0] sm:$0xff] %vm985_vm5, %v4715_v14 }
  0x9a   :  { %v4727_v19 = vpop.permute.xlu1 %1060 }
  0x9b   :  { %1128 = vst.msk [vmem:[#allocation3 + $0xe8] sm:$0xff] %vm985_vm5, %v4727_v19 }
  0x9e   :  { %v4735_v28 = vpop.permute.xlu1 %1070 }
  0x9f   :  { %1133 = vst.msk [vmem:[#allocation3 + $0x110] sm:$0xff] %vm985_vm5, %v4735_v28 }
  0xa2   :  { %v4743_v37 = vpop.permute.xlu1 %1080 }
  0xa3   :  { %1138 = vst.msk [vmem:[#allocation3 + $0x138] sm:$0xff] %vm985_vm5, %v4743_v37 }
  0xa6   :  { %v4751_v46 = vpop.permute.xlu1 %1187 }
  0xa7   :  { %1260 = vst.msk [vmem:[#allocation3 + $0x160] sm:$0xff] %vm985_vm5, %v4751_v46 }
  0xaa   :  { %v4759_v55 = vpop.permute.xlu1 %1197 }
  0xab   :  { %1265 = vst.msk [vmem:[#allocation3 + $0x188] sm:$0xff] %vm985_vm5, %v4759_v55 }
  0xdc   :  { %v4689_v0 = vpop.f32.mrb[0].mxu0 }
  0xdd   :  { %v4691_v1 = vpop.f32.mrb[0].mxu1  ;;  %v4693_v2 = vpop.f32.mrb[1].mxu0 }
  0xde   :  { %v4695_v4 = vpop.f32.mrb[1].mxu1 }
  0xe0   :  { %v4697_v5 = vpop.f32.mrb[2].mxu0 }
  0xe1   :  { %v4699_v6 = vpop.f32.mrb[2].mxu1  ;;  %v4701_v7 = vpop.f32.mrb[3].mxu0 }
  0xe2   :  { %v4703_v8 = vpop.f32.mrb[3].mxu1 }
  0xe4   :  { %v4707_v10 = vpop.f32.mrb[4].mxu0 }
  0xe5   :  { %v4709_v11 = vpop.f32.mrb[4].mxu1  ;;  %v4711_v12 = vpop.f32.mrb[5].mxu0 }
  0xe6   :  { %v4713_v13 = vpop.f32.mrb[5].mxu1 }
  0xe8   :  { %v4719_v15 = vpop.f32.mrb[6].mxu0 }
  0xe9   :  { %v4721_v16 = vpop.f32.mrb[6].mxu1  ;;  %v4723_v17 = vpop.f32.mrb[7].mxu0 }
  0xea   :  { %v4725_v18 = vpop.f32.mrb[7].mxu1 }
  0xec   :  { %v326_v20 = vpop.f32.mrb[8].mxu0 }
  0xed   :  { %v415_v21 = vpop.f32.mrb[8].mxu1  ;;  %v438_v22 = vmax.f32 %v4689_v0, %v326_v20  ;;  %v328_v24 = vpop.f32.mrb[9].mxu0 }
  0xee   :  { %v440_v23 = vmax.f32 %v4691_v1, %v415_v21  ;;  %v417_v25 = vpop.f32.mrb[9].mxu1  ;;  %v439_v26 = vmax.f32 %v4693_v2, %v328_v24  ;;  %v4763_v1 = vpop.permute.xlu1 %1207 }
  0xef   :  { %v441_v27 = vmax.f32 %v4695_v4, %v417_v25  ;;  %1270 = vst.msk [vmem:[#allocation3 + $0x1b0] sm:$0xff] %vm985_vm5, %v4763_v1 }
  0xf0   :  { %v332_v29 = vpop.f32.mrb[10].mxu0 }
  0xf1   :  { %v421_v30 = vpop.f32.mrb[10].mxu1  ;;  %v442_v31 = vmax.f32 %v4697_v5, %v332_v29  ;;  %v334_v33 = vpop.f32.mrb[11].mxu0 }
  0xf2   :  { %v444_v32 = vmax.f32 %v4699_v6, %v421_v30  ;;  %v423_v34 = vpop.f32.mrb[11].mxu1  ;;  %v443_v35 = vmax.f32 %v4701_v7, %v334_v33 }
  0xf3   :  { %v445_v36 = vmax.f32 %v4703_v8, %v423_v34 }
  0xf4   :  { %v338_v38 = vpop.f32.mrb[12].mxu0 }
  0xf5   :  { %v427_v39 = vpop.f32.mrb[12].mxu1  ;;  %v446_v40 = vmax.f32 %v4707_v10, %v338_v38  ;;  %v340_v42 = vpop.f32.mrb[13].mxu0 }
  0xf6   :  { %v448_v41 = vmax.f32 %v4709_v11, %v427_v39  ;;  %v429_v43 = vpop.f32.mrb[13].mxu1  ;;  %v447_v44 = vmax.f32 %v4711_v12, %v340_v42  ;;  %v4767_v12 = vpop.permute.xlu1 %1217 }
  0xf7   :  { %v449_v45 = vmax.f32 %v4713_v13, %v429_v43  ;;  %1275 = vst.msk [vmem:[#allocation3 + $0x1d8] sm:$0xff] %vm985_vm5, %v4767_v12 }
  0xf8   :  { %v344_v47 = vpop.f32.mrb[14].mxu0 }
  0xf9   :  { %v433_v48 = vpop.f32.mrb[14].mxu1  ;;  %v450_v49 = vmax.f32 %v4719_v15, %v344_v47  ;;  %v346_v51 = vpop.f32.mrb[15].mxu0 }
  0xfa   :  { %v452_v50 = vmax.f32 %v4721_v16, %v433_v48  ;;  %v435_v52 = vpop.f32.mrb[15].mxu1  ;;  %v451_v53 = vmax.f32 %v4723_v17, %v346_v51 }
  0xfb   :  { %v453_v54 = vmax.f32 %v4725_v18, %v435_v52 }
  0xfc   :  { %v541_v56 = vpop.f32.mrb[16].mxu0 }
  0xfd   :  { %v630_v57 = vpop.f32.mrb[16].mxu1  ;;  %v653_v58 = vmax.f32 %v438_v22, %v541_v56  ;;  %v543_v60 = vpop.f32.mrb[17].mxu0 }
  0xfe   :  { %v655_v59 = vmax.f32 %v440_v23, %v630_v57  ;;  %v632_v61 = vpop.f32.mrb[17].mxu1  ;;  %v654_v62 = vmax.f32 %v439_v26, %v543_v60 }
  0xff   :  { %v656_v0 = vmax.f32 %v441_v27, %v632_v61 }
 0x100   :  { %v547_v2 = vpop.f32.mrb[18].mxu0 }
 0x101   :  { %v636_v4 = vpop.f32.mrb[18].mxu1  ;;  %v657_v5 = vmax.f32 %v442_v31, %v547_v2  ;;  %v549_v7 = vpop.f32.mrb[19].mxu0 }
 0x102   :  { %v659_v6 = vmax.f32 %v444_v32, %v636_v4  ;;  %v638_v8 = vpop.f32.mrb[19].mxu1  ;;  %v658_v10 = vmax.f32 %v443_v35, %v549_v7  ;;  %v891_v32 = vpop.permute.xlu0 %890 }
 0x103   :  { %v660_v11 = vmax.f32 %v445_v36, %v638_v8 }
 0x104   :  { %v553_v13 = vpop.f32.mrb[20].mxu0 }
 0x105   :  { %v642_v15 = vpop.f32.mrb[20].mxu1  ;;  %v661_v16 = vmax.f32 %v446_v40, %v553_v13  ;;  %v555_v18 = vpop.f32.mrb[21].mxu0 }
 0x106   :  { %v663_v17 = vmax.f32 %v448_v41, %v642_v15  ;;  %v644_v20 = vpop.f32.mrb[21].mxu1  ;;  %v662_v21 = vmax.f32 %v447_v44, %v555_v18 }
 0x107   :  { %v664_v22 = vmax.f32 %v449_v45, %v644_v20 }
 0x108   :  { %v559_v23 = vpop.f32.mrb[22].mxu0 }
 0x109   :  { %v648_v24 = vpop.f32.mrb[22].mxu1  ;;  %v4771_v25 = vmax.f32 %v450_v49, %v559_v23  ;;  %v561_v27 = vpop.f32.mrb[23].mxu0 }
 0x10a   :  { %v4773_v26 = vmax.f32 %v452_v50, %v648_v24  ;;  %v650_v29 = vpop.f32.mrb[23].mxu1  ;;  %v4775_v30 = vmax.f32 %v451_v53, %v561_v27 }
 0x10b   :  { %v4777_v31 = vmax.f32 %v453_v54, %v650_v29 }
 0x10c   :  { %v756_v33 = vpop.f32.mrb[24].mxu0 }
 0x10d   :  { %v845_v34 = vpop.f32.mrb[24].mxu1  ;;  %v868_v35 = vmax.f32 %v653_v58, %v756_v33  ;;  %v758_v38 = vpop.f32.mrb[25].mxu0 }
 0x10e   :  { %v870_v36 = vmax.f32 %v655_v59, %v845_v34  ;;  %v847_v39 = vpop.f32.mrb[25].mxu1  ;;  %v869_v40 = vmax.f32 %v654_v62, %v758_v38  ;;  %v896_v58 = vpop.permute.xlu0 %895 }
 0x10f   :  { %v871_v41 = vmax.f32 %v656_v0, %v847_v39  ;;  %v908_v42 = vadd.f32 %v891_v32, %v868_v35 }
 0x110   :  { %v910_v43 = vadd.f32 %v891_v32, %v870_v36  ;;  %v909_v44 = vadd.f32 %v891_v32, %v869_v40  ;;  %v762_v47 = vpop.f32.mrb[26].mxu0 }
 0x111   :  { %v911_v45 = vadd.f32 %v891_v32, %v871_v41  ;;  %v851_v48 = vpop.f32.mrb[26].mxu1  ;;  %v4779_v49 = vmax.f32 %v908_v42, 0.0  ;;  %v872_v51 = vmax.f32 %v657_v5, %v762_v47  ;;  %v764_v53 = vpop.f32.mrb[27].mxu0 }
 0x112   :  { %v4781_v50 = vmax.f32 %v910_v43, 0.0  ;;  %v874_v52 = vmax.f32 %v659_v6, %v851_v48  ;;  %v853_v54 = vpop.f32.mrb[27].mxu1  ;;  %v4783_v56 = vmax.f32 %v909_v44, 0.0  ;;  %v873_v59 = vmax.f32 %v658_v10, %v764_v53 }
 0x113   :  { %v4785_v57 = vmax.f32 %v911_v45, 0.0  ;;  %v875_v60 = vmax.f32 %v660_v11, %v853_v54  ;;  %v912_v61 = vadd.f32 %v896_v58, %v872_v51  ;;  %1042 = vrot.lane.b32.xlu0 %v4779_v49, %s4368_s0  ;;  %v1350_v51 = vld [vmem:[#allocation3 + $0x188] sm:$0xff] }
 0x114   :  { %v914_v62 = vadd.f32 %v896_v58, %v874_v52  ;;  %1046 = vrot.lane.b32.xlu1 %v4781_v50, %s4368_s0  ;;  %v913_v0 = vadd.f32 %v896_v58, %v873_v59  ;;  %v768_v4 = vpop.f32.mrb[28].mxu0  ;;  %v4793_v6 = vpack.i.bf16 %v4781_v50, %v4783_v56 }
 0x115   :  { %v915_v2 = vadd.f32 %v896_v58, %v875_v60  ;;  %v857_v5 = vpop.f32.mrb[28].mxu1  ;;  %v4795_v7 = vmax.f32 %v912_v61, 0.0  ;;  %v876_v10 = vmax.f32 %v661_v16, %v768_v4  ;;  %v770_v13 = vpop.f32.mrb[29].mxu0 }
 0x116   :  { %v4797_v8 = vmax.f32 %v914_v62, 0.0  ;;  %v878_v11 = vmax.f32 %v663_v17, %v857_v5  ;;  %v859_v15 = vpop.f32.mrb[29].mxu1  ;;  %v4799_v18 = vmax.f32 %v913_v0, 0.0  ;;  %v877_v23 = vmax.f32 %v662_v21, %v770_v13  ;;  %v1341_v62 = vld [vmem:[#allocation3 + $0x20] sm:$0xff]  ;;  %v1344_v13 = vld [vmem:[#allocation3 + $0x98] sm:$0xff] }
 0x117   :  { %v4801_v20 = vmax.f32 %v915_v2, 0.0  ;;  %v879_v24 = vmax.f32 %v664_v22, %v859_v15  ;;  %v916_v27 = vadd.f32 %v4687_v63, %v876_v10  ;;  %1179 = vrot.lane.b32.xlu0 %v4779_v49, %s4369_s27  ;;  %v4811_v16 = vpack.i.bf16 %v4795_v7, %v4779_v49  ;;  %v1342_v2 = vld [vmem:[#allocation3 + $0x48] sm:$0xff]  ;;  %v1343_v10 = vld [vmem:[#allocation3 + $0x70] sm:$0xff] }
 0x118   :  { %v918_v29 = vadd.f32 %v4687_v63, %v878_v11  ;;  %1183 = vrot.lane.b32.xlu1 %v4781_v50, %s4369_s27  ;;  %v917_v17 = vadd.f32 %v4687_v63, %v877_v23  ;;  %v774_v21 = vpop.f32.mrb[30].mxu0  ;;  %v4817_v33 = vpack.i.bf16 %v4797_v8, %v4799_v18  ;;  %v4906_v0 = vpack.i.bf16 %v1341_v62, %v4785_v57  ;;  %v1349_v62 = vld [vmem:[#allocation3 + $0x160] sm:$0xff] }
 0x119   :  { %v919_v32 = vadd.f32 %v4687_v63, %v879_v24  ;;  %v863_v22 = vpop.f32.mrb[30].mxu1  ;;  %v4819_v34 = vmax.f32 %v916_v27, 0.0  ;;  %v880_v36 = vmax.f32 %v4771_v25, %v774_v21  ;;  %v776_v39 = vpop.f32.mrb[31].mxu0  ;;  %v4913_v4 = vpack.i.bf16 %v1342_v2, %v4801_v20 }
 0x11a   :  { %v4821_v35 = vmax.f32 %v918_v29, 0.0  ;;  %v882_v38 = vmax.f32 %v4773_v26, %v863_v22  ;;  %v865_v40 = vpop.f32.mrb[31].mxu1  ;;  %v4825_v41 = vmax.f32 %v917_v17, 0.0  ;;  %v881_v63 = vmax.f32 %v4775_v30, %v776_v39 }
 0x11b   :  { %6478 = vst [vmem:[#allocation5_spill] sm:$0xff] %v4819_v34  ;;  %v4827_v42 = vmax.f32 %v919_v32, 0.0  ;;  %v883_v43 = vmax.f32 %v4777_v31, %v865_v40  ;;  %v920_v44 = vadd.f32 %v4705_v9, %v880_v36  ;;  %1044 = vrot.lane.b32.xlu0 %v4783_v56, %s4368_s0 }
 0x11c   :  { %6479 = vst [vmem:[#allocation6_spill] sm:$0xff] %v4821_v35  ;;  %v922_v45 = vadd.f32 %v4705_v9, %v882_v38  ;;  %1056 = vrot.lane.b32.xlu1 %v4797_v8, %s4368_s0  ;;  %v921_v26 = vadd.f32 %v4705_v9, %v881_v63  ;;  %v4843_v30 = vpack.i.bf16 %v4821_v35, %v4825_v41  ;;  %v1345_v63 = vld [vmem:[#allocation3 + $0xc0] sm:$0xff] }
 0x11d   :  { %v923_v47 = vadd.f32 %v4705_v9, %v883_v43  ;;  %v4845_v31 = vmax.f32 %v920_v44, 0.0  ;;  %v4948_v11 = vpack.i.bf16 %v1343_v10, %v4827_v42 }
 0x11e   :  { %v4847_v48 = vmax.f32 %v922_v45, 0.0  ;;  %v4853_v53 = vmax.f32 %v921_v26, 0.0 }
 0x11f   :  { %6480 = vst [vmem:[#allocation7_spill] sm:$0xff] %v4845_v31  ;;  %v4855_v54 = vmax.f32 %v923_v47, 0.0  ;;  %1048 = vrot.lane.b32.xlu0 %v4785_v57, %s4368_s0  ;;  %v4925_v5 = vpack.i.bf16 %v4845_v31, %v4819_v34 }
 0x120   :  { %6481 = vst [vmem:[#allocation8_spill] sm:$0xff] %v4847_v48  ;;  %1052 = vrot.lane.b32.xlu1 %v4795_v7, %s4368_s0  ;;  %v4867_v59 = vpack.i.bf16 %v4847_v48, %v4853_v53 }
 0x121   :  { %v4953_v15 = vpack.i.bf16 %v1344_v13, %v4855_v54 }
 0x123   :  { %1181 = vrot.lane.b32.xlu0 %v4783_v56, %s4369_s27 }
 0x124   :  { %1193 = vrot.lane.b32.xlu1 %v4797_v8, %s4369_s27 }
 0x127   :  { %1185 = vrot.lane.b32.xlu0 %v4785_v57, %s4369_s27 }
 0x128   :  { %1189 = vrot.lane.b32.xlu1 %v4795_v7, %s4369_s27 }
 0x12b   :  { %1054 = vrot.lane.b32.xlu0 %v4799_v18, %s4368_s0 }
 0x12c   :  { %1066 = vrot.lane.b32.xlu1 %v4821_v35, %s4368_s0 }
 0x12f   :  { %1058 = vrot.lane.b32.xlu0 %v4801_v20, %s4368_s0 }
 0x130   :  { %1203 = vrot.lane.b32.xlu1 %v4821_v35, %s4369_s27 }
 0x133   :  { %1191 = vrot.lane.b32.xlu0 %v4799_v18, %s4369_s27 }
 0x134   :  { %1076 = vrot.lane.b32.xlu1 %v4847_v48, %s4368_s0 }
 0x137   :  { %1195 = vrot.lane.b32.xlu0 %v4801_v20, %s4369_s27 }
 0x138   :  { %1072 = vrot.lane.b32.xlu1 %v4845_v31, %s4368_s0 }
 0x13b   :  { %1062 = vrot.lane.b32.xlu0 %v4819_v34, %s4368_s0 }
 0x13c   :  { %1213 = vrot.lane.b32.xlu1 %v4847_v48, %s4369_s27 }
 0x13f   :  { %1064 = vrot.lane.b32.xlu0 %v4825_v41, %s4368_s0 }
 0x140   :  { %1209 = vrot.lane.b32.xlu1 %v4845_v31, %s4369_s27 }
 0x143   :  { %1068 = vrot.lane.b32.xlu0 %v4827_v42, %s4368_s0 }
 0x144   :  { %4036 = vrot.lane.b32.xlu1 %v4906_v0, %s4370_s28 }
 0x147   :  { %1201 = vrot.lane.b32.xlu0 %v4825_v41, %s4369_s27 }
 0x148   :  { %4051 = vrot.lane.b32.xlu1 %v4913_v4, %s4370_s28 }
 0x14b   :  { %1205 = vrot.lane.b32.xlu0 %v4827_v42, %s4369_s27 }
 0x14c   :  { %4056 = vrot.lane.b32.xlu1 %v4843_v30, %s4370_s28 }
 0x14f   :  { %1074 = vrot.lane.b32.xlu0 %v4853_v53, %s4368_s0 }
 0x150   :  { %4066 = vrot.lane.b32.xlu1 %v4925_v5, %s4370_s28 }
 0x153   :  { %1078 = vrot.lane.b32.xlu0 %v4855_v54, %s4368_s0 }
 0x154   :  { %4071 = vrot.lane.b32.xlu1 %v4867_v59, %s4370_s28 }
 0x157   :  { %1211 = vrot.lane.b32.xlu0 %v4853_v53, %s4369_s27 }
 0x15b   :  { %1215 = vrot.lane.b32.xlu0 %v4855_v54, %s4369_s27 }
 0x15f   :  { %1199 = vrot.lane.b32.xlu0 %v4819_v34, %s4369_s27 }
 0x163   :  { %4031 = vrot.lane.b32.xlu0 %v4793_v6, %s4370_s28 }
 0x167   :  { %4041 = vrot.lane.b32.xlu0 %v4811_v16, %s4370_s28 }
 0x16b   :  { %4046 = vrot.lane.b32.xlu0 %v4817_v33, %s4370_s28 }
 0x16f   :  { %4061 = vrot.lane.b32.xlu0 %v4948_v11, %s4370_s28 }
 0x173   :  { %4076 = vrot.lane.b32.xlu0 %v4953_v15, %s4370_s28 }
 0x185   :  { %v1043_v24 = vpop.permute.xlu0 %1042 }
 0x186   :  { %v1047_v23 = vpop.permute.xlu1 %1046 }
 0x189   :  { %v1180_v29 = vpop.permute.xlu0 %1179 }
 0x18a   :  { %v1184_v27 = vpop.permute.xlu1 %1183 }
 0x18d   :  { %v1045_v32 = vpop.permute.xlu0 %1044 }
 0x18e   :  { %v1057_v17 = vpop.permute.xlu1 %1056  ;;  %v4958_v21 = vsel %vm1082_vm6, %v1043_v24, %v1045_v32  ;;  %v4961_v22 = vsel %vm1082_vm6, %v1045_v32, %v1047_v23 }
 0x18f   :  { %6482 = vst [vmem:[#allocation9_spill] sm:$0xff] %v4958_v21  ;;  %6483 = vst [vmem:[#allocation10_spill] sm:$0xff] %v4961_v22 }
 0x191   :  { %v1049_v36 = vpop.permute.xlu0 %1048 }
 0x192   :  { %v1053_v38 = vpop.permute.xlu1 %1052  ;;  %v4964_v39 = vsel %vm1082_vm6, %v1047_v23, %v1049_v36  ;;  %v4968_v40 = vsel %vm1082_vm6, %v1049_v36, %v4715_v14 }
 0x193   :  { %6484 = vst [vmem:[#allocation11_spill] sm:$0xff] %v4964_v39  ;;  %6485 = vst [vmem:[#allocation12_spill] sm:$0xff] %v4968_v40  ;;  %v4972_v43 = vpack.i.bf16 %v4964_v39, %v4961_v22  ;;  %v4975_v44 = vpack.i.bf16 %v1345_v63, %v4968_v40 }
 0x195   :  { %v1182_v45 = vpop.permute.xlu0 %1181  ;;  %4081 = vrot.lane.b32.xlu0 %v4972_v43, %s4370_s28  ;;  %4086 = vrot.lane.b32.xlu1 %v4975_v44, %s4370_s28 }
 0x196   :  { %v1194_v26 = vpop.permute.xlu1 %1193  ;;  %v4982_v14 = vsel %vm1219_vm7, %v1180_v29, %v1182_v45  ;;  %v4985_v47 = vsel %vm1219_vm7, %v1182_v45, %v1184_v27 }
 0x197   :  { %6486 = vst [vmem:[#allocation13_spill] sm:$0xff] %v4982_v14  ;;  %6487 = vst [vmem:[#allocation14_spill] sm:$0xff] %v4985_v47 }
 0x199   :  { %v1186_v2 = vpop.permute.xlu0 %1185 }
 0x19a   :  { %v1190_v10 = vpop.permute.xlu1 %1189  ;;  %v4988_v13 = vsel %vm1219_vm7, %v1184_v27, %v1186_v2  ;;  %v4992_v23 = vsel %vm1219_vm7, %v1186_v2, %v4751_v46 }
 0x19b   :  { %6488 = vst [vmem:[#allocation15_spill] sm:$0xff] %v4988_v13  ;;  %6489 = vst [vmem:[#allocation16_spill] sm:$0xff] %v4992_v23  ;;  %v4996_v24 = vpack.i.bf16 %v4988_v13, %v4985_v47  ;;  %v4999_v29 = vpack.i.bf16 %v1349_v62, %v4992_v23 }
 0x19d   :  { %v1055_v36 = vpop.permute.xlu0 %1054  ;;  %4091 = vrot.lane.b32.xlu0 %v4996_v24, %s4370_s28  ;;  %4096 = vrot.lane.b32.xlu1 %v4999_v29, %s4370_s28 }
 0x19e   :  { %v1067_v32 = vpop.permute.xlu1 %1066  ;;  %v5006_v27 = vsel %vm1082_vm6, %v1053_v38, %v1055_v36  ;;  %v5009_v46 = vsel %vm1082_vm6, %v1055_v36, %v1057_v17  ;;  %v1346_v38 = vld [vmem:[#allocation3 + $0xe8] sm:$0xff] }
 0x19f   :  { %6490 = vst [vmem:[#allocation17_spill] sm:$0xff] %v5006_v27  ;;  %6491 = vst [vmem:[#allocation18_spill] sm:$0xff] %v5009_v46 }
 0x1a1   :  { %v1059_v2 = vpop.permute.xlu0 %1058 }
 0x1a2   :  { %v1204_v62 = vpop.permute.xlu1 %1203  ;;  %v5016_v58 = vsel %vm1082_vm6, %v1057_v17, %v1059_v2  ;;  %v5020_v61 = vsel %vm1082_vm6, %v1059_v2, %v4727_v19 }
 0x1a3   :  { %6492 = vst [vmem:[#allocation19_spill] sm:$0xff] %v5016_v58  ;;  %6493 = vst [vmem:[#allocation20_spill] sm:$0xff] %v5020_v61  ;;  %v5024_v36 = vpack.i.bf16 %v5016_v58, %v5009_v46  ;;  %v5027_v9 = vpack.i.bf16 %v1346_v38, %v5020_v61  ;;  %v5045_v38 = vpack.i.bf16 %v5006_v27, %v4958_v21 }
 0x1a5   :  { %v1192_v3 = vpop.permute.xlu0 %1191  ;;  %4101 = vrot.lane.b32.xlu0 %v5024_v36, %s4370_s28  ;;  %4106 = vrot.lane.b32.xlu1 %v5027_v9, %s4370_s28 }
 0x1a6   :  { %v1077_v17 = vpop.permute.xlu1 %1076  ;;  %v5038_v19 = vsel %vm1219_vm7, %v1190_v10, %v1192_v3  ;;  %v5041_v2 = vsel %vm1219_vm7, %v1192_v3, %v1194_v26 }
 0x1a7   :  { %6494 = vst [vmem:[#allocation21_spill] sm:$0xff] %v5038_v19  ;;  %6495 = vst [vmem:[#allocation22_spill] sm:$0xff] %v5041_v2 }
 0x1a9   :  { %v1196_v60 = vpop.permute.xlu0 %1195  ;;  %4111 = vrot.lane.b32.xlu0 %v5045_v38, %s4370_s28 }
 0x1aa   :  { %v1073_v52 = vpop.permute.xlu1 %1072  ;;  %v5054_v10 = vsel %vm1219_vm7, %v1194_v26, %v1196_v60  ;;  %v5058_v3 = vsel %vm1219_vm7, %v1196_v60, %v4759_v55  ;;  %v5077_v55 = vpack.i.bf16 %v5038_v19, %v4982_v14  ;;  %v1347_v19 = vld [vmem:[#allocation3 + $0x110] sm:$0xff] }
 0x1ab   :  { %6496 = vst [vmem:[#allocation23_spill] sm:$0xff] %v5054_v10  ;;  %6497 = vst [vmem:[#allocation24_spill] sm:$0xff] %v5058_v3  ;;  %v5062_v25 = vpack.i.bf16 %v5054_v10, %v5041_v2  ;;  %v5065_v63 = vpack.i.bf16 %v1350_v51, %v5058_v3 }
 0x1ad   :  { %v1063_v26 = vpop.permute.xlu0 %1062  ;;  %4116 = vrot.lane.b32.xlu0 %v5062_v25, %s4370_s28  ;;  %4121 = vrot.lane.b32.xlu1 %v5065_v63, %s4370_s28 }
 0x1ae   :  { %v1214_v21 = vpop.permute.xlu1 %1213 }
 0x1b1   :  { %v1065_v51 = vpop.permute.xlu0 %1064  ;;  %4126 = vrot.lane.b32.xlu0 %v5077_v55, %s4370_s28 }
 0x1b2   :  { %v1210_v60 = vpop.permute.xlu1 %1209  ;;  %v5082_v45 = vsel %vm1082_vm6, %v1063_v26, %v1065_v51  ;;  %v5085_v47 = vsel %vm1082_vm6, %v1065_v51, %v1067_v32 }
 0x1b3   :  { %6498 = vst [vmem:[#allocation25_spill] sm:$0xff] %v5082_v45  ;;  %6499 = vst [vmem:[#allocation26_spill] sm:$0xff] %v5085_v47 }
 0x1b5   :  { %v1069_v13 = vpop.permute.xlu0 %1068 }
 0x1b6   :  { %v5087_v10 = vpop.permute.xlu1 %4036  ;;  %v5090_v2 = vsel %vm1082_vm6, %v1067_v32, %v1069_v13  ;;  %v5094_v14 = vsel %vm1082_vm6, %v1069_v13, %v4735_v28 }
 0x1b7   :  { %6500 = vst [vmem:[#allocation27_spill] sm:$0xff] %v5090_v2  ;;  %6501 = vst [vmem:[#allocation28_spill] sm:$0xff] %v5094_v14  ;;  %v5097_v23 = vpack.i.bf16 %v1347_v19, %v5094_v14  ;;  %v5101_v26 = vpack.i.bf16 %v5090_v2, %v5085_v47  ;;  %v4039_v51 = vunpack.i.h.bf16 %v5087_v10  ;;  %v6444_v3 = vunpack.i.l.bf16 %v5087_v10 }
 0x1b9   :  { %v1202_v27 = vpop.permute.xlu0 %1201  ;;  %4136 = vrot.lane.b32.xlu0 %v5097_v23, %s4370_s28  ;;  %4131 = vrot.lane.b32.xlu1 %v5101_v26, %s4370_s28  ;;  %v1537_v19 = vsel %vm1533_vm8, %v6444_v3, %v4039_v51 }
 0x1ba   :  { %v5105_v39 = vpop.permute.xlu1 %4051  ;;  %v5112_v28 = vsel %vm1219_vm7, %v1202_v27, %v1204_v62 }
 0x1bb   :  { %6502 = vst [vmem:[#allocation29_spill] sm:$0xff] %v5112_v28  ;;  %v4054_v13 = vunpack.i.h.bf16 %v5105_v39  ;;  %v6443_v32 = vunpack.i.l.bf16 %v5105_v39 }
 0x1bd   :  { %v1541_v58 = vsel %vm1533_vm8, %v6443_v32, %v4054_v13  ;;  %v1206_v22 = vpop.permute.xlu0 %1205 }
 0x1be   :  { %v3756_v46 = vpack.c.bf16 %v1541_v58, %v1537_v19  ;;  %v5123_v31 = vsel %vm1219_vm7, %v1204_v62, %v1206_v22  ;;  %v5127_v34 = vsel %vm1219_vm7, %v1206_v22, %v4763_v1  ;;  %v1348_v19 = vld [vmem:[#allocation3 + $0x138] sm:$0xff]  ;;  %v5182_v3 = vpop.permute.xlu1 %4056 }
 0x1bf   :  { %6503 = vst [vmem:[#allocation30_spill] sm:$0xff] %v5123_v31  ;;  %6504 = vst [vmem:[#allocation31_spill] sm:$0xff] %v5127_v34  ;;  %v5131_v40 = vpack.i.bf16 %v5123_v31, %v5112_v28 }
 0x1c0   :  { %3757 = vmatprep.subr.bf16.mxu1 %v3756_v46 }
 0x1c1   :  { %v1075_v61 = vpop.permute.xlu0 %1074  ;;  %4141 = vrot.lane.b32.xlu1 %v5131_v40, %s4370_s28 }
 0x1c2   :  { %v5136_v51 = vsel %vm1082_vm6, %v1073_v52, %v1075_v61  ;;  %v5139_v58 = vsel %vm1082_vm6, %v1075_v61, %v1077_v17 }
 0x1c3   :  { %6505 = vst [vmem:[#allocation32_spill] sm:$0xff] %v5136_v51  ;;  %6506 = vst [vmem:[#allocation33_spill] sm:$0xff] %v5139_v58  ;;  %v5178_v1 = vpack.i.bf16 %v5136_v51, %v5082_v45 }
 0x1c5   :  { %v1079_v22 = vpop.permute.xlu0 %1078 }
 0x1c6   :  { %v5146_v46 = vsel %vm1082_vm6, %v1077_v17, %v1079_v22  ;;  %v5150_v13 = vsel %vm1082_vm6, %v1079_v22, %v4743_v37 }
 0x1c7   :  { %6507 = vst [vmem:[#allocation34_spill] sm:$0xff] %v5146_v46  ;;  %6508 = vst [vmem:[#allocation35_spill] sm:$0xff] %v5150_v13  ;;  %v5153_v52 = vpack.i.bf16 %v1348_v19, %v5150_v13  ;;  %v5157_v61 = vpack.i.bf16 %v5146_v46, %v5139_v58  ;;  %v1351_v19 = vld [vmem:[#allocation3 + $0x1b0] sm:$0xff] }
 0x1c8   :  { %v5174_v32 = vpack.i.bf16 %v1351_v19, %v5127_v34  ;;  %v1352_v19 = vld [vmem:[#allocation3 + $0x1d8] sm:$0xff] }
 0x1c9   :  { %v1212_v17 = vpop.permute.xlu0 %1211  ;;  %4151 = vrot.lane.b32.xlu0 %v5153_v52, %s4370_s28  ;;  %4146 = vrot.lane.b32.xlu1 %v5157_v61, %s4370_s28 }
 0x1ca   :  { %v5168_v37 = vsel %vm1219_vm7, %v1210_v60, %v1212_v17  ;;  %v5171_v22 = vsel %vm1219_vm7, %v1212_v17, %v1214_v21 }
 0x1cb   :  { %6509 = vst [vmem:[#allocation36_spill] sm:$0xff] %v5168_v37  ;;  %6510 = vst [vmem:[#allocation37_spill] sm:$0xff] %v5171_v22 }
 0x1cd   :  { %v1216_v2 = vpop.permute.xlu0 %1215  ;;  %4156 = vrot.lane.b32.xlu0 %v5174_v32, %s4370_s28  ;;  %4161 = vrot.lane.b32.xlu1 %v5178_v1, %s4370_s28 }
 0x1ce   :  { %v5189_v60 = vsel %vm1219_vm7, %v1214_v21, %v1216_v2  ;;  %v5193_v17 = vsel %vm1219_vm7, %v1216_v2, %v4767_v12  ;;  %v4067_v12 = vpop.permute.xlu1 %4066 }
 0x1cf   :  { %6511 = vst [vmem:[#allocation38_spill] sm:$0xff] %v5189_v60  ;;  %6512 = vst [vmem:[#allocation39_spill] sm:$0xff] %v5193_v17  ;;  %v5196_v45 = vpack.i.bf16 %v1352_v19, %v5193_v17  ;;  %v5200_v62 = vpack.i.bf16 %v5189_v60, %v5171_v22 }
 0x1d1   :  { %v1200_v21 = vpop.permute.xlu0 %1199  ;;  %4171 = vrot.lane.b32.xlu0 %v5196_v45, %s4370_s28  ;;  %4166 = vrot.lane.b32.xlu1 %v5200_v62, %s4370_s28 }
 0x1d2   :  { %v5211_v2 = vsel %vm1219_vm7, %v1200_v21, %v1202_v27  ;;  %v4072_v51 = vpop.permute.xlu1 %4071 }
 0x1d3   :  { %6513 = vst [vmem:[#allocation40_spill] sm:$0xff] %v5211_v2  ;;  %v5215_v19 = vpack.i.bf16 %v5168_v37, %v5211_v2  ;;  %v4074_v27 = vunpack.i.h.bf16 %v4072_v51  ;;  %v4073_v21 = vunpack.i.l.bf16 %v4072_v51  ;;  %v4059_v37 = vunpack.i.h.bf16 %v5182_v3 }
 0x1d4   :  { %v6514_v51 = vunpack.i.l.bf16 %v5087_v10 }
 0x1d5   :  { %v4032_v22 = vpop.permute.xlu0 %4031  ;;  %4181 = vrot.lane.b32.xlu0 %v4793_v6, %s4371_s29  ;;  %4176 = vrot.lane.b32.xlu1 %v5215_v19, %s4370_s28  ;;  %v4058_v6 = vunpack.i.l.bf16 %v5182_v3  ;;  %v1547_v58 = vsel %vm1533_vm8, %v4073_v21, %v4074_v27 }
 0x1d6   :  { %v4034_v60 = vunpack.i.h.bf16 %v4032_v22  ;;  %v4033_v28 = vunpack.i.l.bf16 %v4032_v22 }
 0x1d8   :  { %v1536_v22 = vsel %vm1533_vm8, %v4034_v60, %v6514_v51  ;;  %v1535_v47 = vsel %vm1533_vm8, %v4033_v28, %v4034_v60 }
 0x1d9   :  { %v4042_v31 = vpop.permute.xlu0 %4041  ;;  %4191 = vrot.lane.b32.xlu0 %v4817_v33, %s4371_s29  ;;  %4186 = vrot.lane.b32.xlu1 %v4906_v0, %s4371_s29  ;;  %v4069_v0 = vunpack.i.h.bf16 %v4067_v12 }
 0x1da   :  { %v4043_v2 = vunpack.i.l.bf16 %v4042_v31  ;;  %v4044_v33 = vunpack.i.h.bf16 %v4042_v31 }
 0x1dc   :  { %v1534_v14 = vsel %vm1533_vm8, %v4043_v2, %v4033_v28  ;;  %v1543_v28 = vsel %vm1533_vm8, %v4058_v6, %v4059_v37 }
 0x1dd   :  { %v4047_v34 = vpop.permute.xlu0 %4046  ;;  %4201 = vrot.lane.b32.xlu0 %v4811_v16, %s4371_s29  ;;  %4196 = vrot.lane.b32.xlu1 %v4913_v4, %s4371_s29  ;;  %v6515_v16 = vunpack.i.l.bf16 %v5105_v39  ;;  %v1546_v39 = vsel %vm1533_vm8, %v4069_v0, %v4073_v21  ;;  %v3736_v60 = vpack.c.bf16 %v1547_v58, %v1543_v28  ;;  %v2643_v0 = vld [vmem:[%s6419_s4 + $0x28] sm:$0xff] }
 0x1de   :  { %v4049_v17 = vunpack.i.h.bf16 %v4047_v34  ;;  %v4048_v46 = vunpack.i.l.bf16 %v4047_v34  ;;  %v4068_v34 = vunpack.i.l.bf16 %v4067_v12 }
 0x1e0   :  { %v1540_v4 = vsel %vm1533_vm8, %v4049_v17, %v6515_v16  ;;  %v1538_v3 = vsel %vm1533_vm8, %v4044_v33, %v4048_v46  ;;  %v1539_v31 = vsel %vm1533_vm8, %v4048_v46, %v4049_v17 }
 0x1e1   :  { %v4062_v13 = vpop.permute.xlu0 %4061  ;;  %v3732_v35 = vpack.c.bf16 %v1539_v31, %v1535_v47  ;;  %v3758_v10 = vpack.c.bf16 %v1540_v4, %v1536_v22  ;;  %v3734_v48 = vpack.c.bf16 %v1538_v3, %v1534_v14  ;;  %4211 = vrot.lane.b32.xlu0 %v4948_v11, %s4371_s29  ;;  %4206 = vrot.lane.b32.xlu1 %v4843_v30, %s4371_s29 }
 0x1e2   :  { %v4064_v2 = vunpack.i.h.bf16 %v4062_v13  ;;  %v4063_v46 = vunpack.i.l.bf16 %v4062_v13  ;;  %v1542_v47 = vsel %vm1533_vm8, %v4068_v34, %v4058_v6 }
 0x1e3   :  { %3733 = vmatprep.subr.bf16.mxu0 %v3732_v35  ;;  %3759 = vmatpush1.bf16.msra.mxu1 %v3758_v10  ;;  %v3738_v30 = vpack.c.bf16 %v1546_v39, %v1542_v47  ;;  %v2645_v10 = vld [vmem:[%s6419_s4 + $0x38] sm:$0xff] }
 0x1e4   :  { %3735 = vmatpush1.bf16.msra.mxu0 %v3734_v48  ;;  %v1544_v35 = vsel %vm1533_vm8, %v4059_v37, %v4063_v46  ;;  %v1545_v48 = vsel %vm1533_vm8, %v4063_v46, %v4064_v2  ;;  %v2644_v37 = vld [vmem:[%s6419_s4 + $0x30] sm:$0xff] }
 0x1e5   :  { %v4077_v17 = vpop.permute.xlu0 %4076  ;;  %3737 = vmatprep.subr.bf16.mxu0 %v3736_v60  ;;  %4221 = vrot.lane.b32.xlu0 %v4953_v15, %s4371_s29 }
 0x1e6   :  { %v4079_v11 = vunpack.i.h.bf16 %v4077_v17  ;;  %v4078_v14 = vunpack.i.l.bf16 %v4077_v17  ;;  %4216 = vrot.lane.b32.xlu1 %v4867_v59, %s4371_s29 }
 0x1e8   :  { %v1548_v58 = vsel %vm1533_vm8, %v4074_v27, %v4078_v14  ;;  %3739 = vmatpush1.bf16.msra.mxu0 %v3738_v30  ;;  %v1549_v13 = vsel %vm1533_vm8, %v4078_v14, %v4079_v11 }
 0x1e9   :  { %v3760_v12 = vpack.c.bf16 %v1549_v13, %v1545_v48  ;;  %v3762_v21 = vpack.c.bf16 %v1548_v58, %v1544_v35  ;;  %4231 = vrot.lane.b32.xlu0 %v4972_v43, %s4371_s29  ;;  %v2639_v43 = vld [vmem:[%s6419_s4 + $0x8] sm:$0xff] }
 0x1ea   :  { %4226 = vrot.lane.b32.xlu1 %v4925_v5, %s4371_s29  ;;  %v2640_v5 = vld [vmem:[%s6419_s4 + $0x10] sm:$0xff] }
 0x1eb   :  { %3761 = vmatprep.subr.bf16.mxu1 %v3760_v12 }
 0x1ec   :  { %3763 = vmatpush1.bf16.msra.mxu1 %v3762_v21 }
 0x1ed   :  { %4241 = vrot.lane.b32.xlu0 %v5024_v36, %s4371_s29 }
 0x1ee   :  { %4236 = vrot.lane.b32.xlu1 %v4975_v44, %s4371_s29 }
 0x1f1   :  { %4251 = vrot.lane.b32.xlu0 %v5045_v38, %s4371_s29  ;;  %v2641_v38 = vld [vmem:[%s6419_s4 + $0x18] sm:$0xff] }
 0x1f2   :  { %4246 = vrot.lane.b32.xlu1 %v5027_v9, %s4371_s29 }
 0x1f5   :  { %4261 = vrot.lane.b32.xlu0 %v5097_v23, %s4371_s29 }
 0x1f6   :  { %4256 = vrot.lane.b32.xlu1 %v5101_v26, %s4371_s29 }
 0x1f9   :  { %4266 = vrot.lane.b32.xlu0 %v4996_v24, %s4371_s29 }
 0x1fa   :  { %4271 = vrot.lane.b32.xlu1 %v4999_v29, %s4371_s29 }
 0x1fd   :  { %4276 = vrot.lane.b32.xlu0 %v5062_v25, %s4371_s29  ;;  %v2638_v25 = vld [vmem:[%s6419_s4] sm:$0xff] }
 0x1fe   :  { %4281 = vrot.lane.b32.xlu1 %v5065_v63, %s4371_s29  ;;  %v2642_v63 = vld [vmem:[%s6419_s4 + $0x20] sm:$0xff] }
 0x201   :  { %4286 = vrot.lane.b32.xlu0 %v5077_v55, %s4371_s29 }
 0x202   :  { %4291 = vrot.lane.b32.xlu1 %v5131_v40, %s4371_s29 }
 0x205   :  { %4301 = vrot.lane.b32.xlu0 %v5153_v52, %s4371_s29 }
 0x206   :  { %4296 = vrot.lane.b32.xlu1 %v5157_v61, %s4371_s29 }
 0x207   :  { %v4082_v9 = vpop.permute.xlu0 %4081  ;;  %v4087_v59 = vpop.permute.xlu1 %4086 }
 0x208   :  { %v4084_v44 = vunpack.i.h.bf16 %v4082_v9  ;;  %v4083_v23 = vunpack.i.l.bf16 %v4082_v9  ;;  %v4088_v24 = vunpack.i.l.bf16 %v4087_v59  ;;  %v4089_v29 = vunpack.i.h.bf16 %v4087_v59 }
 0x209   :  { %4306 = vrot.lane.b32.xlu0 %v5174_v32, %s4371_s29 }
 0x20a   :  { %4311 = vrot.lane.b32.xlu1 %v5178_v1, %s4371_s29  ;;  %v1552_v1 = vsel %vm1533_vm8, %v4084_v44, %v4088_v24  ;;  %v1551_v52 = vsel %vm1533_vm8, %v4083_v23, %v4084_v44  ;;  %v1553_v27 = vsel %vm1533_vm8, %v4088_v24, %v4089_v29 }
 0x20d   :  { %4321 = vrot.lane.b32.xlu0 %v5196_v45, %s4371_s29 }
 0x20e   :  { %4316 = vrot.lane.b32.xlu1 %v5200_v62, %s4371_s29 }
 0x20f   :  { %v5307_v15 = vpop.permute.xlu0 %4091  ;;  %v5309_v40 = vpop.permute.xlu1 %4096 }
 0x210   :  { %v4094_v47 = vunpack.i.h.bf16 %v5307_v15  ;;  %v4093_v17 = vunpack.i.l.bf16 %v5307_v15  ;;  %v4099_v14 = vunpack.i.h.bf16 %v5309_v40  ;;  %v4098_v30 = vunpack.i.l.bf16 %v5309_v40 }
 0x211   :  { %2648 = vperm.xlu0 %4028, %v2638_v25  }
 0x212   :  { %4326 = vrot.lane.b32.xlu1 %v5215_v19, %s4371_s29  ;;  %v1569_v44 = vsel %vm1533_vm8, %v4098_v30, %v4099_v14 }
 0x215   :  { %2658 = vperm.xlu0 %4028, %v2640_v5  }
 0x216   :  { %2653 = vperm.xlu1 %4029, %v2639_v43  }
 0x217   :  { %v4102_v45 = vpop.permute.xlu0 %4101  ;;  %v4107_v36 = vpop.permute.xlu1 %4106 }
 0x218   :  { %v4104_v55 = vunpack.i.h.bf16 %v4102_v45  ;;  %v4103_v26 = vunpack.i.l.bf16 %v4102_v45  ;;  %v4109_v32 = vunpack.i.h.bf16 %v4107_v36  ;;  %v4108_v62 = vunpack.i.l.bf16 %v4107_v36 }
 0x219   :  { %2668 = vperm.xlu0 %4028, %v2642_v63  }
 0x21a   :  { %v1556_v61 = vsel %vm1533_vm8, %v4104_v55, %v4108_v62  ;;  %2663 = vperm.xlu1 %4029, %v2641_v38   ;;  %v1555_v19 = vsel %vm1533_vm8, %v4103_v26, %v4104_v55  ;;  %v1557_v6 = vsel %vm1533_vm8, %v4108_v62, %v4109_v32 }
 0x21b   :  { %v4112_v33 = vpop.permute.xlu0 %4111  ;;  %v3740_v51 = vpack.c.bf16 %v1555_v19, %v1551_v52  ;;  %v3764_v22 = vpack.c.bf16 %v1557_v6, %v1553_v27  ;;  %v3766_v16 = vpack.c.bf16 %v1556_v61, %v1552_v1 }
 0x21c   :  { %v4114_v4 = vunpack.i.h.bf16 %v4112_v33  ;;  %v4113_v3 = vunpack.i.l.bf16 %v4112_v33 }
 0x21d   :  { %2678 = vperm.xlu0 %4028, %v2644_v37   ;;  %3741 = vmatprep.subr.bf16.mxu0 %v3740_v51 }
 0x21e   :  { %v1550_v31 = vsel %vm1533_vm8, %v4113_v3, %v4083_v23  ;;  %v1554_v34 = vsel %vm1533_vm8, %v4114_v4, %v4103_v26  ;;  %2673 = vperm.xlu1 %4029, %v2643_v0   ;;  %3765 = vmatprep.subr.bf16.mxu1 %v3764_v22  ;;  %v1567_v23 = vsel %vm1533_vm8, %v4093_v17, %v4094_v47 }
 0x21f   :  { %3767 = vmatpush1.bf16.msra.mxu1 %v3766_v16  ;;  %v3742_v28 = vpack.c.bf16 %v1554_v34, %v1550_v31  ;;  %v4117_v39 = vpop.permute.xlu0 %4116  ;;  %v4122_v60 = vpop.permute.xlu1 %4121  ;;  %v1568_v34 = vsel %vm1533_vm8, %v4094_v47, %v4098_v30 }
 0x220   :  { %v4124_v35 = vunpack.i.h.bf16 %v4122_v60  ;;  %v4123_v58 = vunpack.i.l.bf16 %v4122_v60  ;;  %v4119_v13 = vunpack.i.h.bf16 %v4117_v39  ;;  %v4118_v12 = vunpack.i.l.bf16 %v4117_v39 }
 0x221   :  { %3743 = vmatpush1.bf16.msra.mxu0 %v3742_v28 }
 0x222   :  { %2683 = vperm.xlu1 %4029, %v2645_v10   ;;  %v1573_v15 = vsel %vm1533_vm8, %v4123_v58, %v4124_v35  ;;  %v1571_v55 = vsel %vm1533_vm8, %v4118_v12, %v4119_v13  ;;  %v1572_v33 = vsel %vm1533_vm8, %v4119_v13, %v4123_v58 }
 0x223   :  { %v4127_v2 = vpop.permute.xlu0 %4126  ;;  %v3772_v22 = vpack.c.bf16 %v1573_v15, %v1569_v44  ;;  %v3748_v39 = vpack.c.bf16 %v1571_v55, %v1567_v23  ;;  %v3774_v35 = vpack.c.bf16 %v1572_v33, %v1568_v34  ;;  %v6531_v33 = vld [vmem:[#allocation18_spill] sm:$0xff]  ;;  %v6537_v34 = vld [vmem:[#allocation35_spill] sm:$0xff] }
 0x224   :  { %v4129_v45 = vunpack.i.h.bf16 %v4127_v2  ;;  %v4128_v52 = vunpack.i.l.bf16 %v4127_v2 }
 0x226   :  { %v1566_v60 = vsel %vm1533_vm8, %v4128_v52, %v4093_v17  ;;  %v1570_v2 = vsel %vm1533_vm8, %v4129_v45, %v4118_v12  ;;  %v3594_v45 = vld [vmem:[%s6420_s3 + $0x40] sm:$0xff] }
 0x227   :  { %v3750_v44 = vpack.c.bf16 %v1570_v2, %v1566_v60  ;;  %v6540_v60 = vld [vmem:[#allocation17_spill] sm:$0xff] }
 0x228   :  { %v6541_v2 = vld [vmem:[#allocation9_spill] sm:$0xff] }
 0x22b   :  { %v4132_v46 = vpop.permute.xlu1 %4131  ;;  %v4137_v11 = vpop.permute.xlu0 %4136 }
 0x22c   :  { %v4138_v21 = vunpack.i.l.bf16 %v4137_v11  ;;  %v4134_v25 = vunpack.i.h.bf16 %v4132_v46  ;;  %v4133_v9 = vunpack.i.l.bf16 %v4132_v46  ;;  %v4139_v59 = vunpack.i.h.bf16 %v4137_v11 }
 0x22e   :  { %v1560_v36 = vsel %vm1533_vm8, %v4134_v25, %v4138_v21  ;;  %v1559_v38 = vsel %vm1533_vm8, %v4133_v9, %v4134_v25  ;;  %v1561_v62 = vsel %vm1533_vm8, %v4138_v21, %v4139_v59 }
 0x233   :  { %v5341_v48 = vpop.permute.xlu1 %4141 }
 0x234   :  { %v4144_v16 = vunpack.i.h.bf16 %v5341_v48  ;;  %v4143_v4 = vunpack.i.l.bf16 %v5341_v48 }
 0x236   :  { %v1575_v25 = vsel %vm1533_vm8, %v4143_v4, %v4144_v16 }
 0x23b   :  { %v4152_v5 = vpop.permute.xlu0 %4151  ;;  %v4147_v43 = vpop.permute.xlu1 %4146 }
 0x23c   :  { %v4154_v24 = vunpack.i.h.bf16 %v4152_v5  ;;  %v4153_v40 = vunpack.i.l.bf16 %v4152_v5  ;;  %v4149_v29 = vunpack.i.h.bf16 %v4147_v43  ;;  %v4148_v63 = vunpack.i.l.bf16 %v4147_v43 }
 0x23e   :  { %v1564_v26 = vsel %vm1533_vm8, %v4149_v29, %v4153_v40  ;;  %v1563_v32 = vsel %vm1533_vm8, %v4148_v63, %v4149_v29  ;;  %v1565_v1 = vsel %vm1533_vm8, %v4153_v40, %v4154_v24 }
 0x23f   :  { %v4157_v61 = vpop.permute.xlu0 %4156  ;;  %v4162_v37 = vpop.permute.xlu1 %4161  ;;  %v3744_v19 = vpack.c.bf16 %v1563_v32, %v1559_v38  ;;  %v3768_v27 = vpack.c.bf16 %v1565_v1, %v1561_v62  ;;  %v3770_v6 = vpack.c.bf16 %v1564_v26, %v1560_v36  ;;  %v6516_v26 = vpack.c.bf16 %v4801_v20, %v4785_v57  ;;  %v3595_v1 = vld [vmem:[%s6420_s3 + $0x48] sm:$0xff] }
 0x240   :  { %v4164_v0 = vunpack.i.h.bf16 %v4162_v37  ;;  %v4163_v51 = vunpack.i.l.bf16 %v4162_v37  ;;  %v4159_v3 = vunpack.i.h.bf16 %v4157_v61  ;;  %v4158_v31 = vunpack.i.l.bf16 %v4157_v61 }
 0x241   :  { %3745 = vmatprep.subr.bf16.mxu0 %v3744_v19  ;;  %3769 = vmatprep.subr.bf16.mxu1 %v3768_v27  ;;  %v6517_v32 = vpack.c.bf16 %v4799_v18, %v4783_v56  ;;  %v6518_v62 = vpack.c.bf16 %v4797_v8, %v4781_v50  ;;  %v6519_v20 = vpack.c.bf16 %v4855_v54, %v4827_v42  ;;  %v6520_v61 = vmov 0.0   ;;  %v6523_v8 = vld [vmem:[#allocation8_spill] sm:$0xff]  ;;  %v6524_v18 = vld [vmem:[#allocation6_spill] sm:$0xff]  ;;  %v3596_v42 = vld [vmem:[%s6420_s3 + $0x50] sm:$0xff] }
 0x242   :  { %v1558_v10 = vsel %vm1533_vm8, %v4163_v51, %v4133_v9  ;;  %v1562_v28 = vsel %vm1533_vm8, %v4164_v0, %v4148_v63  ;;  %3771 = vmatpush1.bf16.msra.mxu1 %v3770_v6  ;;  %v1576_v47 = vsel %vm1533_vm8, %v4144_v16, %v4158_v31  ;;  %v1577_v30 = vsel %vm1533_vm8, %v4158_v31, %v4159_v3  ;;  %v6532_v0 = vld [vmem:[#allocation10_spill] sm:$0xff]  ;;  %v6535_v16 = vld [vmem:[#allocation11_spill] sm:$0xff]  ;;  %v3597_v3 = vld [vmem:[%s6420_s3 + $0x58] sm:$0xff] }
 0x243   :  { %v4172_v46 = vpop.permute.xlu0 %4171  ;;  %v4167_v11 = vpop.permute.xlu1 %4166  ;;  %3773 = vmatprep.subr.bf16.mxu1 %v3772_v22  ;;  %v3746_v14 = vpack.c.bf16 %v1562_v28, %v1558_v10  ;;  %v6521_v50 = vpack.c.bf16 %v4795_v7, %v4779_v49  ;;  %v6522_v56 = vpack.c.bf16 %v4853_v53, %v4825_v41  ;;  %v6525_v37 = vpack.c.bf16 %v6523_v8, %v6524_v18  ;;  %v6526_v49 = vld [vmem:[#allocation20_spill] sm:$0xff]  ;;  %v6529_v41 = vld [vmem:[#allocation5_spill] sm:$0xff]  ;;  %v6530_v53 = vld [vmem:[#allocation7_spill] sm:$0xff] }
 0x244   :  { %v4174_v58 = vunpack.i.h.bf16 %v4172_v46  ;;  %v4173_v48 = vunpack.i.l.bf16 %v4172_v46  ;;  %v4169_v13 = vunpack.i.h.bf16 %v4167_v11  ;;  %v4168_v21 = vunpack.i.l.bf16 %v4167_v11  ;;  %v6527_v7 = vld [vmem:[#allocation12_spill] sm:$0xff]  ;;  %v6534_v22 = vld [vmem:[#allocation19_spill] sm:$0xff] }
 0x245   :  { %3747 = vmatpush1.bf16.msra.mxu0 %v3746_v14  ;;  %v6528_v27 = vpack.c.bf16 %v6526_v49, %v6527_v7  ;;  %v3786_v6 = vpack.c.bf16 %v6530_v53, %v6529_v41  ;;  %v6533_v51 = vpack.c.bf16 %v6531_v33, %v6532_v0  ;;  %v6538_v10 = vld [vmem:[#allocation28_spill] sm:$0xff]  ;;  %v6542_v46 = vpack.c.bf16 %v6540_v60, %v6541_v2  ;;  %v6564_v49 = vld [vmem:[#allocation21_spill] sm:$0xff] }
 0x246   :  { %v1580_v17 = vsel %vm1533_vm8, %v4169_v13, %v4173_v48  ;;  %3749 = vmatprep.subr.bf16.mxu0 %v3748_v39  ;;  %3775 = vmatpush1.bf16.msra.mxu1 %v3774_v35  ;;  %v1581_v12 = vsel %vm1533_vm8, %v4173_v48, %v4174_v58  ;;  %v1579_v9 = vsel %vm1533_vm8, %v4168_v21, %v4169_v13  ;;  %v6543_v35 = vld [vmem:[#allocation33_spill] sm:$0xff]  ;;  %v6544_v58 = vld [vmem:[#allocation26_spill] sm:$0xff] }
 0x247   :  { %v3778_v59 = vpack.c.bf16 %v1580_v17, %v1576_v47  ;;  %v5367_v5 = vpop.permute.xlu0 %4181  ;;  %v4177_v43 = vpop.permute.xlu1 %4176  ;;  %v3776_v15 = vpack.c.bf16 %v1581_v12, %v1577_v30  ;;  %v3752_v23 = vpack.c.bf16 %v1579_v9, %v1575_v25  ;;  %v6539_v28 = vpack.c.bf16 %v6537_v34, %v6538_v10  ;;  %v6546_v13 = vld [vmem:[#allocation34_spill] sm:$0xff]  ;;  %v3598_v30 = vld [vmem:[%s6420_s3 + $0x60] sm:$0xff]  ;;  %v6549_v17 = vld [vmem:[#allocation24_spill] sm:$0xff] }
 0x248   :  { %v4179_v24 = vunpack.i.h.bf16 %v4177_v43  ;;  %v4178_v40 = vunpack.i.l.bf16 %v4177_v43  ;;  %v6545_v48 = vpack.c.bf16 %v6543_v35, %v6544_v58  ;;  %v6550_v12 = vld [vmem:[#allocation16_spill] sm:$0xff]  ;;  %v6565_v7 = vld [vmem:[#allocation13_spill] sm:$0xff] }
 0x249   :  { %3751 = vmatpush1.bf16.msra.mxu0 %v3750_v44  ;;  %3777 = vmatprep.subr.bf16.mxu1 %v3776_v15  ;;  %v6551_v9 = vpack.c.bf16 %v6549_v17, %v6550_v12  ;;  %v6568_v33 = vld [vmem:[#allocation29_spill] sm:$0xff]  ;;  %v6573_v35 = vld [vmem:[#allocation36_spill] sm:$0xff] }
 0x24a   :  { %v1574_v29 = vsel %vm1533_vm8, %v4178_v40, %v4143_v4  ;;  %v1578_v63 = vsel %vm1533_vm8, %v4179_v24, %v4168_v21  ;;  %3753 = vmatprep.subr.bf16.mxu0 %v3752_v23  ;;  %3779 = vmatpush1.bf16.msra.mxu1 %v3778_v59  ;;  %v6536_v4 = vpack.c.bf16 %v6534_v22, %v6535_v16  ;;  %v6547_v21 = vld [vmem:[#allocation27_spill] sm:$0xff]  ;;  %v6552_v24 = vld [vmem:[#allocation32_spill] sm:$0xff]  ;;  %v6553_v40 = vld [vmem:[#allocation25_spill] sm:$0xff] }
 0x24b   :  { %v3754_v36 = vpack.c.bf16 %v1578_v63, %v1574_v29  ;;  %v5374_v38 = vpop.permute.xlu0 %4191  ;;  %v5376_v55 = vpop.permute.xlu1 %4186  ;;  %3805 = vmatprep.subr.bf16.mxu1 %v6516_v26  ;;  %v6548_v47 = vpack.c.bf16 %v6546_v13, %v6547_v21  ;;  %v6554_v29 = vpack.c.bf16 %v6552_v24, %v6553_v40  ;;  %v6555_v63 = vld [vmem:[#allocation22_spill] sm:$0xff]  ;;  %v6559_v26 = vld [vmem:[#allocation15_spill] sm:$0xff]  ;;  %v6574_v58 = vld [vmem:[#allocation40_spill] sm:$0xff] }
 0x24c   :  { %v4189_v59 = vunpack.i.h.bf16 %v5376_v55  ;;  %v4188_v43 = vunpack.i.l.bf16 %v5376_v55  ;;  %v4194_v15 = vunpack.i.h.bf16 %v5374_v38  ;;  %v4193_v23 = vunpack.i.l.bf16 %v5374_v38  ;;  %v6558_v55 = vld [vmem:[#allocation23_spill] sm:$0xff]  ;;  %v6571_v22 = vld [vmem:[#allocation30_spill] sm:$0xff]  ;;  %v3601_v13 = vld [vmem:[%s6420_s3 + $0x78] sm:$0xff] }
 0x24d   :  { %3755 = vmatpush1.bf16.msra.mxu0 %v3754_v36  ;;  %3610 = vmatmul.mubr.msk.f32.vlgmr.msra.gmra.mrb[32].mxu1 %vm1630_vm9, %v3594_v45 }
 0x24e   :  { %3781 = vmatprep.subr.bf16.mxu0 %v6517_v32  ;;  %3807 = vmatpush1.bf16.msra.mxu1 %v6518_v62  ;;  %v6560_v32 = vpack.c.bf16 %v6558_v55, %v6559_v26  ;;  %v3599_v62 = vld [vmem:[%s6420_s3 + $0x68] sm:$0xff]  ;;  %v2265_v53 = vsel %vm1630_vm9, %v4193_v23, %v4194_v15 }
 0x24f   :  { %v5391_v52 = vpop.permute.xlu0 %4201  ;;  %v5393_v57 = vpop.permute.xlu1 %4196  ;;  %3809 = vmatprep.subr.bf16.mxu1 %v6519_v20  ;;  %1838 = vmatprep.mubr.f32.mxu1 %v6520_v61 }
 0x250   :  { %3602 = vmatmul.mubr.msk.f32.vlgmr.msra.gmra.mrb[32].mxu0 %vm1630_vm9, %v3594_v45  ;;  %v4199_v11 = vunpack.i.h.bf16 %v5393_v57  ;;  %v4198_v14 = vunpack.i.l.bf16 %v5393_v57  ;;  %v6556_v45 = vld [vmem:[#allocation14_spill] sm:$0xff]  ;;  %v4183_v57 = vunpack.i.l.bf16 %v5367_v5  ;;  %v4203_v18 = vunpack.i.l.bf16 %v5391_v52 }
 0x251   :  { %3611 = vmatmul.mubr.msk.f32.gmra.mrb[34].mxu1 %vm1630_vm9, %v3595_v1  ;;  %3783 = vmatpush1.bf16.msra.mxu0 %v6521_v50  ;;  %v6557_v36 = vpack.c.bf16 %v6555_v63, %v6556_v45  ;;  %v6561_v50 = vld [vmem:[#allocation39_spill] sm:$0xff] }
 0x252   :  { %3785 = vmatprep.subr.bf16.mxu0 %v6522_v56  ;;  %3811 = vmatpush1.bf16.msra.mxu1 %v6525_v37  ;;  %v2267_v38 = vsel %vm1630_vm9, %v4198_v14, %v4199_v11  ;;  %v6562_v56 = vld [vmem:[#allocation31_spill] sm:$0xff]  ;;  %v5522_v34 = vsel %vm1630_vm9, %v4203_v18, %v4183_v57  ;;  %v2266_v2 = vsel %vm1630_vm9, %v4194_v15, %v4198_v14 }
 0x253   :  { %v5413_v54 = vpop.permute.xlu0 %4211  ;;  %v5415_v19 = vpop.permute.xlu1 %4206  ;;  %1725 = vmatprep.mubr.f32.mxu0 %v6520_v61  ;;  %3813 = vmatprep.subr.bf16.mxu1 %v6528_v27  ;;  %v6563_v8 = vpack.c.bf16 %v6561_v50, %v6562_v56  ;;  %v6566_v27 = vpack.c.bf16 %v6564_v49, %v6565_v7  ;;  %v1277_v56 = vld [vmem:[%s6420_s3 + $0x8] sm:$0xff] }
 0x254   :  { %3603 = vmatmul.mubr.msk.f32.gmra.mrb[34].mxu0 %vm1630_vm9, %v3595_v1  ;;  %1844 = vmatprep.mubr.f32.mxu1 %v6520_v61  ;;  %v4184_v1 = vunpack.i.h.bf16 %v5367_v5  ;;  %v4204_v5 = vunpack.i.h.bf16 %v5391_v52  ;;  %v3600_v52 = vld [vmem:[%s6420_s3 + $0x70] sm:$0xff]  ;;  %v4214_v14 = vunpack.i.h.bf16 %v5413_v54 }
 0x255   :  { %3612 = vmatmul.mubr.msk.f32.gmra.mrb[36].mxu1 %vm1630_vm9, %v3596_v42  ;;  %3787 = vmatpush1.bf16.msra.mxu0 %v3786_v6  ;;  %v6567_v6 = vld [vmem:[#allocation37_spill] sm:$0xff] }
 0x256   :  { %3789 = vmatprep.subr.bf16.mxu0 %v6533_v51  ;;  %3815 = vmatpush1.bf16.msra.mxu1 %v6536_v4  ;;  %v6569_v0 = vpack.c.bf16 %v6567_v6, %v6568_v33  ;;  %v6570_v51 = vld [vmem:[#allocation38_spill] sm:$0xff]  ;;  %v5529_v60 = vsel %vm1630_vm9, %v4204_v5, %v4193_v23  ;;  %v2262_v21 = vsel %vm1630_vm9, %v4184_v1, %v4188_v43 }
 0x257   :  { %v5435_v31 = vpop.permute.xlu0 %4221  ;;  %1731 = vmatprep.mubr.f32.mxu0 %v6520_v61  ;;  %3817 = vmatprep.subr.bf16.mxu1 %v6539_v28  ;;  %v6572_v16 = vpack.c.bf16 %v6570_v51, %v6571_v22  ;;  %v3854_v17 = vpack.c.bf16 %v2266_v2, %v2262_v21 }
 0x258   :  { %v5441_v39 = vpop.permute.xlu1 %4216  ;;  %3604 = vmatmul.mubr.msk.f32.gmra.mrb[36].mxu0 %vm1630_vm9, %v3596_v42  ;;  %1850 = vmatprep.mubr.f32.mxu1 %v6520_v61  ;;  %v2263_v42 = vsel %vm1630_vm9, %v4188_v43, %v4189_v59  ;;  %v4223_v11 = vunpack.i.l.bf16 %v5435_v31 }
 0x259   :  { %3613 = vmatmul.mubr.msk.f32.gmra.mrb[38].mxu1 %vm1630_vm9, %v3597_v3  ;;  %3791 = vmatpush1.bf16.msra.mxu0 %v6542_v46  ;;  %v3852_v41 = vpack.c.bf16 %v2267_v38, %v2263_v42  ;;  %v4224_v46 = vunpack.i.h.bf16 %v5435_v31  ;;  %v4219_v59 = vunpack.i.h.bf16 %v5441_v39  ;;  %v4218_v43 = vunpack.i.l.bf16 %v5441_v39  ;;  %v1276_v39 = vld [vmem:[%s6420_s3] sm:$0xff] }
 0x25a   :  { %3793 = vmatprep.subr.bf16.mxu0 %v6545_v48  ;;  %3819 = vmatpush1.bf16.msra.mxu1 %v6548_v47  ;;  %v6575_v48 = vpack.c.bf16 %v6573_v35, %v6574_v58  ;;  %v4213_v47 = vunpack.i.l.bf16 %v5413_v54 }
 0x25b   :  { %v5460_v25 = vpop.permute.xlu0 %4231  ;;  %1737 = vmatprep.mubr.f32.mxu0 %v6520_v61  ;;  %3821 = vmatprep.subr.bf16.mxu1 %v6551_v9  ;;  %v4209_v9 = vunpack.i.h.bf16 %v5415_v19  ;;  %v2275_v54 = vsel %vm1630_vm9, %v4223_v11, %v4224_v46 }
 0x25c   :  { %v5468_v44 = vpop.permute.xlu1 %4226  ;;  %3605 = vmatmul.mubr.msk.f32.gmra.mrb[38].mxu0 %vm1630_vm9, %v3597_v3  ;;  %1856 = vmatprep.mubr.f32.mxu1 %v6520_v61  ;;  %v2261_v3 = vsel %vm1630_vm9, %v4183_v57, %v4184_v1  ;;  %v4234_v55 = vunpack.i.h.bf16 %v5460_v25  ;;  %v4233_v26 = vunpack.i.l.bf16 %v5460_v25  ;;  %v2273_v57 = vsel %vm1630_vm9, %v4218_v43, %v4219_v59 }
 0x25d   :  { %3614 = vmatmul.mubr.msk.f32.gmra.mrb[40].mxu1 %vm1630_vm9, %v3598_v30  ;;  %3795 = vmatpush1.bf16.msra.mxu0 %v6554_v29  ;;  %v3828_v28 = vpack.c.bf16 %v2265_v53, %v2261_v3  ;;  %v4229_v15 = vunpack.i.h.bf16 %v5468_v44  ;;  %v4228_v23 = vunpack.i.l.bf16 %v5468_v44  ;;  %v4208_v29 = vunpack.i.l.bf16 %v5415_v19 }
 0x25e   :  { %3797 = vmatprep.subr.bf16.mxu0 %v6557_v36  ;;  %3823 = vmatpush1.bf16.msra.mxu1 %v6560_v32  ;;  %v2271_v44 = vsel %vm1630_vm9, %v4213_v47, %v4214_v14  ;;  %v2274_v19 = vsel %vm1630_vm9, %v4219_v59, %v4223_v11  ;;  %v2270_v18 = vsel %vm1630_vm9, %v4209_v9, %v4213_v47 }
 0x25f   :  { %v5490_v20 = vpop.permute.xlu0 %4241  ;;  %1743 = vmatprep.mubr.f32.mxu0 %v6520_v61  ;;  %3825 = vmatprep.subr.bf16.mxu1 %v6563_v8  ;;  %v3856_v1 = vpack.c.bf16 %v2275_v54, %v2271_v44  ;;  %v2272_v25 = vsel %vm1630_vm9, %v4229_v15, %v4218_v43  ;;  %v2269_v5 = vsel %vm1630_vm9, %v4208_v29, %v4209_v9 }
 0x260   :  { %v5497_v37 = vpop.permute.xlu1 %4236  ;;  %3606 = vmatmul.mubr.msk.f32.gmra.mrb[40].mxu0 %vm1630_vm9, %v3598_v30  ;;  %1862 = vmatprep.mubr.f32.mxu1 %v6520_v61  ;;  %v3830_v30 = vpack.c.bf16 %v5529_v60, %v5522_v34  ;;  %v4244_v63 = vunpack.i.h.bf16 %v5490_v20  ;;  %v4243_v45 = vunpack.i.l.bf16 %v5490_v20  ;;  %v2268_v20 = vsel %vm1630_vm9, %v4228_v23, %v4208_v29 }
 0x261   :  { %3615 = vmatmul.mubr.msk.f32.gmra.mrb[42].mxu1 %vm1630_vm9, %v3599_v62  ;;  %3799 = vmatpush1.bf16.msra.mxu0 %v6566_v27  ;;  %v4239_v32 = vunpack.i.h.bf16 %v5497_v37  ;;  %v3858_v7 = vpack.c.bf16 %v2274_v19, %v2270_v18  ;;  %v2277_v6 = vsel %vm1630_vm9, %v4233_v26, %v4234_v55  ;;  %v3834_v33 = vpack.c.bf16 %v2272_v25, %v2268_v20 }
 0x262   :  { %3801 = vmatprep.subr.bf16.mxu0 %v6569_v0  ;;  %3827 = vmatpush1.bf16.msra.mxu1 %v6572_v16  ;;  %v2281_v49 = vsel %vm1630_vm9, %v4243_v45, %v4244_v63 }
 0x263   :  { %v5517_v4 = vpop.permute.xlu0 %4251  ;;  %1749 = vmatprep.mubr.f32.mxu0 %v6520_v61  ;;  %3853 = vmatprep.subr.bf16.mxu1 %v3852_v41  ;;  %v3832_v41 = vpack.c.bf16 %v2273_v57, %v2269_v5 }
 0x264   :  { %v5524_v10 = vpop.permute.xlu1 %4246  ;;  %3607 = vmatmul.mubr.msk.f32.gmra.mrb[42].mxu0 %vm1630_vm9, %v3599_v62  ;;  %1868 = vmatprep.mubr.f32.mxu1 %v6520_v61  ;;  %v4238_v62 = vunpack.i.l.bf16 %v5497_v37  ;;  %v4253_v50 = vunpack.i.l.bf16 %v5517_v4  ;;  %v4254_v37 = vunpack.i.h.bf16 %v5517_v4  ;;  %v3836_v4 = vpack.c.bf16 %v2281_v49, %v2277_v6 }
 0x265   :  { %3616 = vmatmul.mubr.msk.f32.gmra.mrb[44].mxu1 %vm1630_vm9, %v3600_v52  ;;  %3803 = vmatpush1.bf16.msra.mxu0 %v6575_v48  ;;  %v4249_v24 = vunpack.i.h.bf16 %v5524_v10  ;;  %v4248_v40 = vunpack.i.l.bf16 %v5524_v10 }
 0x266   :  { %3829 = vmatprep.subr.bf16.mxu0 %v3828_v28  ;;  %1755 = vmatprep.mubr.f32.mxu0 %v6520_v61  ;;  %v2279_v53 = vsel %vm1630_vm9, %v4238_v62, %v4239_v32  ;;  %v2278_v22 = vsel %vm1630_vm9, %v4234_v55, %v4238_v62  ;;  %v2276_v16 = vsel %vm1630_vm9, %v4253_v50, %v4233_v26  ;;  %v1280_v55 = vld [vmem:[%s6420_s3 + $0x20] sm:$0xff] }
 0x267   :  { %v5545_v31 = vpop.permute.xlu0 %4261  ;;  %1874 = vmatprep.mubr.f32.mxu1 %v6520_v61  ;;  %v2283_v8 = vsel %vm1630_vm9, %v4248_v40, %v4249_v24  ;;  %v2282_v0 = vsel %vm1630_vm9, %v4244_v63, %v4248_v40  ;;  %v2280_v3 = vsel %vm1630_vm9, %v4254_v37, %v4243_v45 }
 0x268   :  { %v5550_v12 = vpop.permute.xlu1 %4256  ;;  %3608 = vmatmul.mubr.msk.f32.gmra.mrb[44].mxu0 %vm1630_vm9, %v3600_v52  ;;  %v3860_v51 = vpack.c.bf16 %v2283_v8, %v2279_v53  ;;  %v1278_v52 = vld [vmem:[%s6420_s3 + $0x10] sm:$0xff]  ;;  %v4264_v34 = vunpack.i.h.bf16 %v5545_v31  ;;  %v4263_v10 = vunpack.i.l.bf16 %v5545_v31  ;;  %v3862_v2 = vpack.c.bf16 %v2282_v0, %v2278_v22  ;;  %v1281_v53 = vld [vmem:[%s6420_s3 + $0x28] sm:$0xff] }
 0x269   :  { %3617 = vmatmul.mubr.msk.f32.gmra.mrb[46].mxu1 %vm1630_vm9, %v3601_v13  ;;  %1761 = vmatprep.mubr.f32.mxu0 %v6520_v61  ;;  %v4259_v28 = vunpack.i.h.bf16 %v5550_v12  ;;  %v4258_v46 = vunpack.i.l.bf16 %v5550_v12 }
 0x26a   :  { %2082 = vmatprep.mubr.f32.mxu1 %v6520_v61  ;;  %v2287_v43 = vsel %vm1630_vm9, %v4263_v10, %v4264_v34 }
 0x26b   :  { %v5570_v36 = vpop.permute.xlu0 %4266  ;;  %v2286_v9 = vsel %vm1630_vm9, %v4259_v28, %v4263_v10  ;;  %v2285_v24 = vsel %vm1630_vm9, %v4258_v46, %v4259_v28 }
 0x26c   :  { %v5577_v38 = vpop.permute.xlu1 %4271  ;;  %3609 = vmatmul.mubr.msk.f32.gmra.mrb[46].mxu0 %vm1630_vm9, %v3601_v13  ;;  %v4269_v11 = vunpack.i.h.bf16 %v5570_v36  ;;  %v4268_v35 = vunpack.i.l.bf16 %v5570_v36 }
 0x26d   :  { %3626 = vmatmul.mubr.msk.f32.vlgmr.msra.gmra.mrb[32].mxu1 %vm1630_vm9, %v1276_v39  ;;  %1969 = vmatprep.mubr.f32.mxu0 %v6520_v61  ;;  %v4274_v48 = vunpack.i.h.bf16 %v5577_v38  ;;  %v4273_v13 = vunpack.i.l.bf16 %v5577_v38 }
 0x26e   :  { %3855 = vmatpush1.bf16.msra.mxu1 %v3854_v17  ;;  %2088 = vmatprep.mubr.f32.mxu1 %v6520_v61  ;;  %v3838_v17 = vpack.c.bf16 %v2280_v3, %v2276_v16  ;;  %v5641_v40 = vsel %vm1630_vm9, %v4268_v35, %v4269_v11 }
 0x26f   :  { %3857 = vmatprep.subr.bf16.mxu1 %v3856_v1  ;;  %v5594_v42 = vpop.permute.xlu0 %4276  ;;  %v2295_v63 = vsel %vm1630_vm9, %v4273_v13, %v4274_v48 }
 0x270   :  { %v4282_v27 = vpop.permute.xlu1 %4281  ;;  %3618 = vmatmul.mubr.msk.f32.vlgmr.msra.gmra.mrb[32].mxu0 %vm1630_vm9, %v1276_v39  ;;  %v4279_v47 = vunpack.i.h.bf16 %v5594_v42  ;;  %v4278_v31 = vunpack.i.l.bf16 %v5594_v42 }
 0x271   :  { %3831 = vmatpush1.bf16.msra.mxu0 %v3830_v30  ;;  %3627 = vmatmul.mubr.msk.f32.gmra.mrb[34].mxu1 %vm1630_vm9, %v1277_v56  ;;  %v4284_v21 = vunpack.i.h.bf16 %v4282_v27  ;;  %v4283_v14 = vunpack.i.l.bf16 %v4282_v27  ;;  %v1279_v30 = vld [vmem:[%s6420_s3 + $0x18] sm:$0xff] }
 0x272   :  { %3833 = vmatprep.subr.bf16.mxu0 %v3832_v41  ;;  %3859 = vmatpush1.bf16.msra.mxu1 %v3858_v7  ;;  %v2297_v32 = vsel %vm1630_vm9, %v4278_v31, %v4279_v47  ;;  %v2294_v7 = vsel %vm1630_vm9, %v4269_v11, %v4273_v13 }
 0x273   :  { %3861 = vmatprep.subr.bf16.mxu1 %v3860_v51  ;;  %v5612_v60 = vpop.permute.xlu0 %4286  ;;  %1975 = vmatprep.mubr.f32.mxu0 %v6520_v61  ;;  %v2299_v45 = vsel %vm1630_vm9, %v4283_v14, %v4284_v21  ;;  %v2298_v44 = vsel %vm1630_vm9, %v4279_v47, %v4283_v14  ;;  %v3844_v6 = vpack.c.bf16 %v2297_v32, %v5641_v40  ;;  %v3639_v40 = vld [vmem:[%s6420_s3 + $0xa8] sm:$0xff] }
 0x274   :  { %v5618_v58 = vpop.permute.xlu1 %4291  ;;  %3619 = vmatmul.mubr.msk.f32.gmra.mrb[34].mxu0 %vm1630_vm9, %v1277_v56  ;;  %2094 = vmatprep.mubr.f32.mxu1 %v6520_v61  ;;  %v4289_v62 = vunpack.i.h.bf16 %v5612_v60  ;;  %v4288_v20 = vunpack.i.l.bf16 %v5612_v60  ;;  %v3868_v8 = vpack.c.bf16 %v2299_v45, %v2295_v63 }
 0x275   :  { %3835 = vmatpush1.bf16.msra.mxu0 %v3834_v33  ;;  %3628 = vmatmul.mubr.msk.f32.gmra.mrb[36].mxu1 %vm1630_vm9, %v1278_v52  ;;  %v4294_v18 = vunpack.i.h.bf16 %v5618_v58  ;;  %v4293_v37 = vunpack.i.l.bf16 %v5618_v58  ;;  %v3870_v33 = vpack.c.bf16 %v2298_v44, %v2294_v7 }
 0x276   :  { %3837 = vmatprep.subr.bf16.mxu0 %v3836_v4  ;;  %3863 = vmatpush1.bf16.msra.mxu1 %v3862_v2  ;;  %v2292_v16 = vsel %vm1630_vm9, %v4288_v20, %v4268_v35  ;;  %v2296_v12 = vsel %vm1630_vm9, %v4289_v62, %v4278_v31  ;;  %v1282_v2 = vld [vmem:[%s6420_s3 + $0x30] sm:$0xff] }
 0x277   :  { %v4302_v59 = vpop.permute.xlu0 %4301  ;;  %1981 = vmatprep.mubr.f32.mxu0 %v6520_v61  ;;  %2100 = vmatprep.mubr.f32.mxu1 %v6520_v61  ;;  %v2301_v36 = vsel %vm1630_vm9, %v4293_v37, %v4294_v18  ;;  %v3846_v48 = vpack.c.bf16 %v2296_v12, %v2292_v16 }
 0x278   :  { %v4304_v54 = vunpack.i.h.bf16 %v4302_v59  ;;  %v4303_v15 = vunpack.i.l.bf16 %v4302_v59  ;;  %v4297_v23 = vpop.permute.xlu1 %4296  ;;  %3620 = vmatmul.mubr.msk.f32.gmra.mrb[36].mxu0 %vm1630_vm9, %v1278_v52 }
 0x279   :  { %v4299_v39 = vunpack.i.h.bf16 %v4297_v23  ;;  %v4298_v29 = vunpack.i.l.bf16 %v4297_v23  ;;  %3839 = vmatpush1.bf16.msra.mxu0 %v3838_v17  ;;  %3629 = vmatmul.mubr.msk.f32.gmra.mrb[38].mxu1 %vm1630_vm9, %v1279_v30  ;;  %v3637_v23 = vld [vmem:[%s6420_s3 + $0x98] sm:$0xff] }
 0x27a   :  { %1987 = vmatprep.mubr.f32.mxu0 %v6520_v61  ;;  %2106 = vmatprep.mubr.f32.mxu1 %v6520_v61  ;;  %v2291_v26 = vsel %vm1630_vm9, %v4303_v15, %v4304_v54  ;;  %v3635_v54 = vld [vmem:[%s6420_s3 + $0x88] sm:$0xff] }
 0x27b   :  { %v2290_v38 = vsel %vm1630_vm9, %v4299_v39, %v4303_v15  ;;  %v4307_v19 = vpop.permute.xlu0 %4306  ;;  %v2289_v1 = vsel %vm1630_vm9, %v4298_v29, %v4299_v39  ;;  %v3864_v57 = vpack.c.bf16 %v2291_v26, %v2287_v43  ;;  %v3634_v43 = vld [vmem:[%s6420_s3 + $0x80] sm:$0xff]  ;;  %v3636_v15 = vld [vmem:[%s6420_s3 + $0x90] sm:$0xff] }
 0x27c   :  { %v3866_v25 = vpack.c.bf16 %v2290_v38, %v2286_v9  ;;  %v4312_v50 = vpop.permute.xlu1 %4311  ;;  %3621 = vmatmul.mubr.msk.f32.gmra.mrb[38].mxu0 %vm1630_vm9, %v1279_v30  ;;  %v3840_v56 = vpack.c.bf16 %v2289_v1, %v2285_v24  ;;  %v4309_v27 = vunpack.i.h.bf16 %v4307_v19  ;;  %v4308_v41 = vunpack.i.l.bf16 %v4307_v19  ;;  %v1283_v30 = vld [vmem:[%s6420_s3 + $0x38] sm:$0xff]  ;;  %v3638_v24 = vld [vmem:[%s6420_s3 + $0xa0] sm:$0xff]  ;;  %v3640_v39 = vld [vmem:[%s6420_s3 + $0xb0] sm:$0xff] }
 0x27d   :  { %v4314_v5 = vunpack.i.h.bf16 %v4312_v50  ;;  %v4313_v49 = vunpack.i.l.bf16 %v4312_v50  ;;  %3630 = vmatmul.mubr.msk.f32.gmra.mrb[40].mxu1 %vm1630_vm9, %v1280_v55  ;;  %3865 = vmatprep.subr.bf16.mxu1 %v3864_v57 }
 0x27e   :  { %3841 = vmatprep.subr.bf16.mxu0 %v3840_v56  ;;  %3867 = vmatpush1.bf16.msra.mxu1 %v3866_v25  ;;  %v2302_v60 = vsel %vm1630_vm9, %v4294_v18, %v4308_v41  ;;  %v2303_v42 = vsel %vm1630_vm9, %v4308_v41, %v4309_v27 }
 0x27f   :  { %v2284_v0 = vsel %vm1630_vm9, %v4313_v49, %v4258_v46  ;;  %v2288_v51 = vsel %vm1630_vm9, %v4314_v5, %v4298_v29  ;;  %v4322_v22 = vpop.permute.xlu0 %4321  ;;  %1993 = vmatprep.mubr.f32.mxu0 %v6520_v61  ;;  %3869 = vmatprep.subr.bf16.mxu1 %v3868_v8  ;;  %v3641_v29 = vld [vmem:[%s6420_s3 + $0xb8] sm:$0xff] }
 0x280   :  { %v3842_v52 = vpack.c.bf16 %v2288_v51, %v2284_v0  ;;  %v4324_v4 = vunpack.i.h.bf16 %v4322_v22  ;;  %v4323_v3 = vunpack.i.l.bf16 %v4322_v22  ;;  %v4317_v34 = vpop.permute.xlu1 %4316  ;;  %3622 = vmatmul.mubr.msk.f32.gmra.mrb[40].mxu0 %vm1630_vm9, %v1280_v55  ;;  %2112 = vmatprep.mubr.f32.mxu1 %v6520_v61 }
 0x281   :  { %v4319_v10 = vunpack.i.h.bf16 %v4317_v34  ;;  %v4318_v28 = vunpack.i.l.bf16 %v4317_v34  ;;  %3631 = vmatmul.mubr.msk.f32.gmra.mrb[42].mxu1 %vm1630_vm9, %v1281_v53  ;;  %1999 = vmatprep.mubr.f32.mxu0 %v6520_v61 }
 0x282   :  { %3843 = vmatpush1.bf16.msra.mxu0 %v3842_v52  ;;  %3871 = vmatpush1.bf16.msra.mxu1 %v3870_v33  ;;  %v2307_v46 = vsel %vm1630_vm9, %v4323_v3, %v4324_v4 }
 0x283   :  { %v2306_v11 = vsel %vm1630_vm9, %v4319_v10, %v4323_v3  ;;  %3845 = vmatprep.subr.bf16.mxu0 %v3844_v6  ;;  %2118 = vmatprep.mubr.f32.mxu1 %v6520_v61  ;;  %v3872_v35 = vpack.c.bf16 %v2307_v46, %v2303_v42  ;;  %v2305_v58 = vsel %vm1630_vm9, %v4318_v28, %v4319_v10 }
 0x284   :  { %v3874_v13 = vpack.c.bf16 %v2306_v11, %v2302_v60  ;;  %v4327_v21 = vpop.permute.xlu1 %4326  ;;  %3623 = vmatmul.mubr.msk.f32.gmra.mrb[42].mxu0 %vm1630_vm9, %v1281_v53  ;;  %v3848_v14 = vpack.c.bf16 %v2305_v58, %v2301_v36 }
 0x285   :  { %v4329_v47 = vunpack.i.h.bf16 %v4327_v21  ;;  %v4328_v31 = vunpack.i.l.bf16 %v4327_v21  ;;  %3632 = vmatmul.mubr.msk.f32.gmra.mrb[44].mxu1 %vm1630_vm9, %v1282_v2  ;;  %3873 = vmatprep.subr.bf16.mxu1 %v3872_v35 }
 0x286   :  { %3847 = vmatpush1.bf16.msra.mxu0 %v3846_v48  ;;  %3875 = vmatpush1.bf16.msra.mxu1 %v3874_v13 }
 0x287   :  { %v2300_v17 = vsel %vm1630_vm9, %v4328_v31, %v4293_v37  ;;  %v2304_v9 = vsel %vm1630_vm9, %v4329_v47, %v4318_v28  ;;  %3849 = vmatprep.subr.bf16.mxu0 %v3848_v14  ;;  %2005 = vmatprep.mubr.f32.mxu0 %v6520_v61 }
 0x288   :  { %v3850_v59 = vpack.c.bf16 %v2304_v9, %v2300_v17  ;;  %3624 = vmatmul.mubr.msk.f32.gmra.mrb[44].mxu0 %vm1630_vm9, %v1282_v2  ;;  %2124 = vmatprep.mubr.f32.mxu1 %v6520_v61 }
 0x289   :  { %3633 = vmatmul.mubr.msk.f32.gmra.mrb[46].mxu1 %vm1630_vm9, %v1283_v30  ;;  %2011 = vmatprep.mubr.f32.mxu0 %v6520_v61 }
 0x28a   :  { %3851 = vmatpush1.bf16.msra.mxu0 %v3850_v59  ;;  %2557 = vmatprep.mubr.f32.mxu1 %v6520_v61 }
 0x28c   :  { %3625 = vmatmul.mubr.msk.f32.gmra.mrb[46].mxu0 %vm1630_vm9, %v1283_v30 }
 0x28d   :  { %3650 = vmatmul.mubr.msk.f32.vlgmr.msra.gmra.mrb[32].mxu1 %vm1630_vm9, %v3634_v43  ;;  %2444 = vmatprep.mubr.f32.mxu0 %v6520_v61 }
 0x28e   :  { %2563 = vmatprep.mubr.f32.mxu1 %v6520_v61 }
 0x290   :  { %3642 = vmatmul.mubr.msk.f32.vlgmr.msra.gmra.mrb[32].mxu0 %vm1630_vm9, %v3634_v43  ;;  %v2649_v63 = vpop.permute.xlu0 %2648 }
 0x291   :  { %3651 = vmatmul.mubr.msk.f32.gmra.mrb[34].mxu1 %vm1630_vm9, %v3635_v54  ;;  %2450 = vmatprep.mubr.f32.mxu0 %v6520_v61 }
 0x292   :  { %2569 = vmatprep.mubr.f32.mxu1 %v6520_v61 }
 0x294   :  { %3643 = vmatmul.mubr.msk.f32.gmra.mrb[34].mxu0 %vm1630_vm9, %v3635_v54  ;;  %v2659_v22 = vpop.permute.xlu0 %2658 }
 0x295   :  { %3652 = vmatmul.mubr.msk.f32.gmra.mrb[36].mxu1 %vm1630_vm9, %v3636_v15  ;;  %2456 = vmatprep.mubr.f32.mxu0 %v6520_v61  ;;  %v2654_v57 = vpop.permute.xlu1 %2653 }
 0x296   :  { %2575 = vmatprep.mubr.f32.mxu1 %v6520_v61 }
 0x298   :  { %3644 = vmatmul.mubr.msk.f32.gmra.mrb[36].mxu0 %vm1630_vm9, %v3636_v15 }
 0x299   :  { %3653 = vmatmul.mubr.msk.f32.gmra.mrb[38].mxu1 %vm1630_vm9, %v3637_v23  ;;  %2462 = vmatprep.mubr.f32.mxu0 %v6520_v61  ;;  %v2664_v36 = vpop.permute.xlu1 %2663 }
 0x29a   :  { %2581 = vmatprep.mubr.f32.mxu1 %v6520_v61 }
 0x29c   :  { %3645 = vmatmul.mubr.msk.f32.gmra.mrb[38].mxu0 %vm1630_vm9, %v3637_v23 }
 0x29d   :  { %3654 = vmatmul.mubr.msk.f32.gmra.mrb[40].mxu1 %vm1630_vm9, %v3638_v24  ;;  %2468 = vmatprep.mubr.f32.mxu0 %v6520_v61 }
 0x29e   :  { %2587 = vmatprep.mubr.f32.mxu1 %v6520_v61 }
 0x2a0   :  { %3646 = vmatmul.mubr.msk.f32.gmra.mrb[40].mxu0 %vm1630_vm9, %v3638_v24 }
 0x2a1   :  { %3655 = vmatmul.mubr.msk.f32.gmra.mrb[42].mxu1 %vm1630_vm9, %v3639_v40  ;;  %2474 = vmatprep.mubr.f32.mxu0 %v6520_v61 }
 0x2a2   :  { %2593 = vmatprep.mubr.f32.mxu1 %v6520_v61 }
 0x2a4   :  { %3647 = vmatmul.mubr.msk.f32.gmra.mrb[42].mxu0 %vm1630_vm9, %v3639_v40 }
 0x2a5   :  { %3656 = vmatmul.mubr.msk.f32.gmra.mrb[44].mxu1 %vm1630_vm9, %v3640_v39  ;;  %2480 = vmatprep.mubr.f32.mxu0 %v6520_v61 }
 0x2a6   :  { %2599 = vmatprep.mubr.f32.mxu1 %v6520_v61 }
 0x2a8   :  { %3648 = vmatmul.mubr.msk.f32.gmra.mrb[44].mxu0 %vm1630_vm9, %v3640_v39 }
 0x2a9   :  { %3657 = vmatmul.mubr.msk.f32.gmra.mrb[46].mxu1 %vm1630_vm9, %v3641_v29  ;;  %2486 = vmatprep.mubr.f32.mxu0 %v6520_v61 }
 0x2ac   :  { %3649 = vmatmul.mubr.msk.f32.gmra.mrb[46].mxu0 %vm1630_vm9, %v3641_v29 }
 0x360   :  { %v2559_v45 = vpop.f32.mrb[32].mxu1 }
 0x361   :  { %v5763_v44 = vadd.f32 %v2649_v63, %v2559_v45  ;;  %v2561_v55 = vpop.f32.mrb[33].mxu1 }
 0x362   :  { %v5773_v20 = vadd.f32 %v2649_v63, %v2561_v55  ;;  %v2669_v55 = vpop.permute.xlu0 %2668 }
 0x363   :  { %v2720_v26 = vmax.f32 %v5763_v44, 0.0  ;;  %v2446_v32 = vpop.f32.mrb[32].mxu0 }
 0x364   :  { %v2448_v62 = vpop.f32.mrb[33].mxu0  ;;  %v2565_v38 = vpop.f32.mrb[34].mxu1  ;;  %v5771_v61 = vadd.f32 %v2649_v63, %v2446_v32  ;;  %v2721_v7 = vmax.f32 %v5773_v20, 0.0  ;;  %v3207_v20 = vld [vmem:[%s6421_s5 + $0xc8] sm:$0x1f] }
 0x365   :  { %v5766_v19 = vadd.f32 %v2649_v63, %v2448_v62  ;;  %2850 = vrot.lane.b32.xlu1 %v2720_v26, %s4370_s28  ;;  %v2567_v1 = vpop.f32.mrb[35].mxu1  ;;  %v5786_v53 = vadd.f32 %v2654_v57, %v2565_v38  ;;  %v2674_v32 = vpop.permute.xlu1 %2673 }
 0x366   :  { %v2718_v5 = vmax.f32 %v5771_v61, 0.0  ;;  %v5796_v16 = vadd.f32 %v2654_v57, %v2567_v1 }
 0x367   :  { %v2719_v25 = vmax.f32 %v5766_v19, 0.0  ;;  %v2452_v50 = vpop.f32.mrb[34].mxu0  ;;  %v2724_v3 = vmax.f32 %v5786_v53, 0.0 }
 0x368   :  { %v5776_v56 = vadd.f32 %v2654_v57, %v2452_v50  ;;  %v2454_v8 = vpop.f32.mrb[35].mxu0  ;;  %v2571_v18 = vpop.f32.mrb[36].mxu1  ;;  %v2725_v60 = vmax.f32 %v5796_v16, 0.0 }
 0x369   :  { %v2573_v37 = vpop.f32.mrb[37].mxu1  ;;  %2848 = vrot.lane.b32.xlu0 %v2719_v25, %s4370_s28  ;;  %v5784_v27 = vadd.f32 %v2654_v57, %v2454_v8  ;;  %v5809_v2 = vadd.f32 %v2659_v22, %v2571_v18 }
 0x36a   :  { %v2722_v49 = vmax.f32 %v5776_v56, 0.0  ;;  %v5813_v11 = vadd.f32 %v2659_v22, %v2573_v37 }
 0x36b   :  { %v2458_v41 = vpop.f32.mrb[36].mxu0  ;;  %v2723_v52 = vmax.f32 %v5784_v27, 0.0  ;;  %v2728_v14 = vmax.f32 %v5809_v2, 0.0 }
 0x36c   :  { %v4330_v6 = vpack.i.bf16 %v2722_v49, %v2718_v5  ;;  %v2460_v33 = vpop.f32.mrb[37].mxu0  ;;  %v2577_v0 = vpop.f32.mrb[38].mxu1  ;;  %v5816_v13 = vadd.f32 %v2659_v22, %v2458_v41  ;;  %v2729_v30 = vmax.f32 %v5813_v11, 0.0 }
 0x36d   :  { %v2579_v51 = vpop.f32.mrb[39].mxu1  ;;  %2852 = vrot.lane.b32.xlu0 %v2721_v7, %s4370_s28  ;;  %v5800_v34 = vadd.f32 %v2659_v22, %v2460_v33  ;;  %v5836_v15 = vadd.f32 %v2664_v36, %v2577_v0 }
 0x36e   :  { %4331 = vrot.lane.b32.xlu1 %v4330_v6, %s4370_s28  ;;  %v2726_v43 = vmax.f32 %v5816_v13, 0.0  ;;  %v5842_v40 = vadd.f32 %v2664_v36, %v2579_v51 }
 0x36f   :  { %v2464_v4 = vpop.f32.mrb[38].mxu0  ;;  %v2727_v35 = vmax.f32 %v5800_v34, 0.0  ;;  %v2732_v62 = vmax.f32 %v5836_v15, 0.0 }
 0x370   :  { %v2466_v12 = vpop.f32.mrb[39].mxu0  ;;  %v2583_v10 = vpop.f32.mrb[40].mxu1  ;;  %v5811_v42 = vadd.f32 %v2664_v36, %v2464_v4  ;;  %v2733_v57 = vmax.f32 %v5842_v40, 0.0 }
 0x371   :  { %v2585_v28 = vpop.f32.mrb[41].mxu1  ;;  %2856 = vrot.lane.b32.xlu0 %v2723_v52, %s4370_s28  ;;  %v5827_v17 = vadd.f32 %v2664_v36, %v2466_v12  ;;  %v5853_v50 = vadd.f32 %v2669_v55, %v2583_v10 }
 0x372   :  { %2858 = vrot.lane.b32.xlu1 %v2724_v3, %s4370_s28  ;;  %v2730_v47 = vmax.f32 %v5811_v42, 0.0  ;;  %v5865_v41 = vadd.f32 %v2669_v55, %v2585_v28  ;;  %v2679_v28 = vpop.permute.xlu0 %2678 }
 0x373   :  { %v2470_v46 = vpop.f32.mrb[40].mxu0  ;;  %v2731_v39 = vmax.f32 %v5827_v17, 0.0  ;;  %v6473_v33 = vmax.f32 %v5853_v50, 0.0 }
 0x374   :  { %v2472_v58 = vpop.f32.mrb[41].mxu0  ;;  %v2589_v48 = vpop.f32.mrb[42].mxu1  ;;  %v4335_v23 = vpack.i.bf16 %v2730_v47, %v2726_v43  ;;  %v5860_v37 = vadd.f32 %v2669_v55, %v2470_v46  ;;  %v2737_v22 = vmax.f32 %v5865_v41, 0.0 }
 0x375   :  { %v2591_v21 = vpop.f32.mrb[43].mxu1  ;;  %2860 = vrot.lane.b32.xlu0 %v2725_v60, %s4370_s28  ;;  %v5850_v38 = vadd.f32 %v2669_v55, %v2472_v58  ;;  %v5880_v12 = vadd.f32 %v2674_v32, %v2589_v48 }
 0x376   :  { %2864 = vrot.lane.b32.xlu1 %v2727_v35, %s4370_s28  ;;  %v2734_v51 = vmax.f32 %v5860_v37, 0.0  ;;  %v5890_v36 = vadd.f32 %v2674_v32, %v2591_v21 }
 0x377   :  { %v2476_v31 = vpop.f32.mrb[42].mxu0  ;;  %v2735_v6 = vmax.f32 %v5850_v38, 0.0  ;;  %v6472_v58 = vmax.f32 %v5880_v12, 0.0 }
 0x378   :  { %v2478_v9 = vpop.f32.mrb[43].mxu0  ;;  %v2595_v59 = vpop.f32.mrb[44].mxu1  ;;  %v5855_v8 = vadd.f32 %v2674_v32, %v2476_v31 }
 0x379   :  { %v2597_v54 = vpop.f32.mrb[45].mxu1  ;;  %2866 = vrot.lane.b32.xlu0 %v2728_v14, %s4370_s28  ;;  %v5878_v4 = vadd.f32 %v2674_v32, %v2478_v9  ;;  %v2684_v31 = vpop.permute.xlu1 %2683  ;;  %v6474_v9 = vmax.f32 %v5890_v36, 0.0 }
 0x37a   :  { %2868 = vrot.lane.b32.xlu1 %v2729_v30, %s4370_s28  ;;  %v6475_v0 = vmax.f32 %v5855_v8, 0.0  ;;  %v5907_v55 = vadd.f32 %v2679_v28, %v2597_v54  ;;  %v6578_v41 = vmax.f32 %v5855_v8, 0.0 }
 0x37b   :  { %v2482_v24 = vpop.f32.mrb[44].mxu0  ;;  %v6463_v46 = vmax.f32 %v5878_v4, 0.0 }
 0x37c   :  { %v2484_v29 = vpop.f32.mrb[45].mxu0  ;;  %v2601_v63 = vpop.f32.mrb[46].mxu1  ;;  %v4340_v10 = vpack.i.bf16 %v6475_v0, %v2734_v51  ;;  %v5910_v32 = vadd.f32 %v2679_v28, %v2482_v24 }
 0x37d   :  { %v2603_v45 = vpop.f32.mrb[47].mxu1  ;;  %4336 = vrot.lane.b32.xlu0 %v4335_v23, %s4370_s28  ;;  %v5894_v48 = vadd.f32 %v2679_v28, %v2484_v29  ;;  %v5903_v23 = vadd.f32 %v2679_v28, %v2595_v59  ;;  %v5930_v24 = vadd.f32 %v2684_v31, %v2601_v63 }
 0x37e   :  { %2872 = vrot.lane.b32.xlu1 %v2731_v39, %s4370_s28 }
 0x37f   :  { %v2488_v1 = vpop.f32.mrb[46].mxu0  ;;  %v6464_v29 = vmax.f32 %v5894_v48, 0.0 }
 0x380   :  { %v2490_v18 = vpop.f32.mrb[47].mxu0  ;;  %v5905_v21 = vadd.f32 %v2684_v31, %v2488_v1  ;;  %v6471_v1 = vmax.f32 %v5907_v55, 0.0 }
 0x381   :  { %2874 = vrot.lane.b32.xlu0 %v2732_v62, %s4370_s28  ;;  %v5921_v54 = vadd.f32 %v2684_v31, %v2490_v18 }
 0x382   :  { %2876 = vrot.lane.b32.xlu1 %v2733_v57, %s4370_s28  ;;  %v6466_v59 = vmax.f32 %v5905_v21, 0.0 }
 0x383   :  { %v6469_v18 = vmax.f32 %v5921_v54, 0.0 }
 0x385   :  { %2880 = vrot.lane.b32.xlu0 %v2735_v6, %s4370_s28 }
 0x386   :  { %2882 = vrot.lane.b32.xlu1 %v6473_v33, %s4370_s28 }
 0x389   :  { %2884 = vrot.lane.b32.xlu0 %v2737_v22, %s4370_s28 }
 0x38a   :  { %4341 = vrot.lane.b32.xlu1 %v4340_v10, %s4370_s28  ;;  %v6465_v10 = vmax.f32 %v5903_v23, 0.0 }
 0x38d   :  { %2888 = vrot.lane.b32.xlu0 %v6463_v46, %s4370_s28  ;;  %v6470_v46 = vmax.f32 %v5910_v32, 0.0 }
 0x38e   :  { %2890 = vrot.lane.b32.xlu1 %v6472_v58, %s4370_s28 }
 0x38f   :  { %v4345_v28 = vpack.i.bf16 %v6466_v59, %v6470_v46  ;;  %v3353_v59 = vld [vmem:[%s6421_s5 + $0x10] sm:$0xff]  ;;  %v3355_v46 = vld [vmem:[%s6421_s5 + $0x20] sm:$0xff] }
 0x391   :  { %2892 = vrot.lane.b32.xlu0 %v6474_v9, %s4370_s28 }
 0x392   :  { %2896 = vrot.lane.b32.xlu1 %v6464_v29, %s4370_s28  ;;  %v5936_v29 = vadd.f32 %v2684_v31, %v2603_v45  ;;  %v4372_v45 = vmov 0.0|0.0   ;;  %v3351_v31 = vld [vmem:[%s6421_s5] sm:$0xff] }
 0x393   :  { %3916 = vmatprep.subr.bf16.mxu1 %v4372_v45  ;;  %3876 = vmatprep.subr.bf16.mxu0 %v4372_v45 }
 0x394   :  { %v6468_v63 = vmax.f32 %v5936_v29, 0.0 }
 0x395   :  { %2898 = vrot.lane.b32.xlu0 %v6465_v10, %s4370_s28  ;;  %v6467_v10 = vmax.f32 %v5930_v24, 0.0 }
 0x396   :  { %2900 = vrot.lane.b32.xlu1 %v6471_v1, %s4370_s28  ;;  %v3356_v1 = vld [vmem:[%s6421_s5 + $0x28] sm:$0xff] }
 0x399   :  { %4346 = vrot.lane.b32.xlu0 %v4345_v28, %s4370_s28  ;;  %v3352_v28 = vld [vmem:[%s6421_s5 + $0x8] sm:$0xff] }
 0x39a   :  { %2904 = vrot.lane.b32.xlu1 %v6469_v18, %s4370_s28 }
 0x39d   :  { %2906 = vrot.lane.b32.xlu0 %v6467_v10, %s4370_s28  ;;  %v3917_v10 = vpack.c.bf16 %v3352_v28, %v3351_v31  ;;  %v3923_v31 = vpack.c.bf16 %v3356_v1, %v3355_v46  ;;  %v3359_v46 = vld [vmem:[%s6421_s5 + $0x40] sm:$0xff]  ;;  %v3360_v1 = vld [vmem:[%s6421_s5 + $0x48] sm:$0xff]  ;;  %v3361_v28 = vld [vmem:[%s6421_s5 + $0x50] sm:$0xff] }
 0x39e   :  { %2908 = vrot.lane.b32.xlu1 %v6468_v63, %s4370_s28  ;;  %v3354_v63 = vld [vmem:[%s6421_s5 + $0x18] sm:$0xff] }
 0x39f   :  { %3918 = vmatpush1.bf16.msra.mxu1 %v3917_v10  ;;  %v3920_v18 = vpack.c.bf16 %v3354_v63, %v3353_v59  ;;  %3878 = vmatpush1.bf16.msra.mxu0 %v3917_v10  ;;  %v3357_v10 = vld [vmem:[%s6421_s5 + $0x30] sm:$0xff]  ;;  %v3358_v59 = vld [vmem:[%s6421_s5 + $0x38] sm:$0xff] }
 0x3a0   :  { %3919 = vmatprep.subr.bf16.mxu1 %v4372_v45  ;;  %3879 = vmatprep.subr.bf16.mxu0 %v4372_v45  ;;  %v3926_v63 = vpack.c.bf16 %v3358_v59, %v3357_v10  ;;  %v3363_v59 = vld [vmem:[%s6421_s5 + $0x60] sm:$0xff] }
 0x3a3   :  { %3921 = vmatpush1.bf16.msra.mxu1 %v3920_v18  ;;  %3881 = vmatpush1.bf16.msra.mxu0 %v3920_v18  ;;  %v3929_v18 = vpack.c.bf16 %v3360_v1, %v3359_v46  ;;  %v3365_v1 = vld [vmem:[%s6421_s5 + $0x70] sm:$0xff] }
 0x3a4   :  { %3922 = vmatprep.subr.bf16.mxu1 %v4372_v45  ;;  %3882 = vmatprep.subr.bf16.mxu0 %v4372_v45 }
 0x3a7   :  { %3924 = vmatpush1.bf16.msra.mxu1 %v3923_v31  ;;  %3884 = vmatpush1.bf16.msra.mxu0 %v3923_v31  ;;  %v3362_v31 = vld [vmem:[%s6421_s5 + $0x58] sm:$0xff] }
 0x3a8   :  { %3925 = vmatprep.subr.bf16.mxu1 %v4372_v45  ;;  %3885 = vmatprep.subr.bf16.mxu0 %v4372_v45  ;;  %v3932_v10 = vpack.c.bf16 %v3362_v31, %v3361_v28  ;;  %v3367_v31 = vld [vmem:[%s6421_s5 + $0x80] sm:$0xff] }
 0x3ab   :  { %3927 = vmatpush1.bf16.msra.mxu1 %v3926_v63  ;;  %3887 = vmatpush1.bf16.msra.mxu0 %v3926_v63  ;;  %v3364_v63 = vld [vmem:[%s6421_s5 + $0x68] sm:$0xff] }
 0x3ac   :  { %3928 = vmatprep.subr.bf16.mxu1 %v4372_v45  ;;  %3888 = vmatprep.subr.bf16.mxu0 %v4372_v45  ;;  %v3935_v46 = vpack.c.bf16 %v3364_v63, %v3363_v59  ;;  %v3369_v63 = vld [vmem:[%s6421_s5 + $0x90] sm:$0xff] }
 0x3af   :  { %3930 = vmatpush1.bf16.msra.mxu1 %v3929_v18  ;;  %3890 = vmatpush1.bf16.msra.mxu0 %v3929_v18  ;;  %v3366_v18 = vld [vmem:[%s6421_s5 + $0x78] sm:$0xff] }
 0x3b0   :  { %3931 = vmatprep.subr.bf16.mxu1 %v4372_v45  ;;  %3891 = vmatprep.subr.bf16.mxu0 %v4372_v45  ;;  %v3938_v28 = vpack.c.bf16 %v3366_v18, %v3365_v1  ;;  %v3371_v18 = vld [vmem:[%s6421_s5 + $0xa0] sm:$0xff] }
 0x3b3   :  { %3933 = vmatpush1.bf16.msra.mxu1 %v3932_v10  ;;  %3893 = vmatpush1.bf16.msra.mxu0 %v3932_v10  ;;  %v3368_v10 = vld [vmem:[%s6421_s5 + $0x88] sm:$0xff] }
 0x3b4   :  { %3934 = vmatprep.subr.bf16.mxu1 %v4372_v45  ;;  %3894 = vmatprep.subr.bf16.mxu0 %v4372_v45  ;;  %v3941_v59 = vpack.c.bf16 %v3368_v10, %v3367_v31  ;;  %v3373_v10 = vld [vmem:[%s6421_s5 + $0xb0] sm:$0xff] }
 0x3b7   :  { %3936 = vmatpush1.bf16.msra.mxu1 %v3935_v46  ;;  %3896 = vmatpush1.bf16.msra.mxu0 %v3935_v46  ;;  %v3370_v46 = vld [vmem:[%s6421_s5 + $0x98] sm:$0xff] }
 0x3b8   :  { %3937 = vmatprep.subr.bf16.mxu1 %v4372_v45  ;;  %3897 = vmatprep.subr.bf16.mxu0 %v4372_v45  ;;  %v3944_v1 = vpack.c.bf16 %v3370_v46, %v3369_v63  ;;  %v3375_v46 = vld [vmem:[%s6421_s5 + $0xc0] sm:$0xff] }
 0x3bb   :  { %3939 = vmatpush1.bf16.msra.mxu1 %v3938_v28  ;;  %3899 = vmatpush1.bf16.msra.mxu0 %v3938_v28  ;;  %v3372_v28 = vld [vmem:[%s6421_s5 + $0xa8] sm:$0xff] }
 0x3bc   :  { %3940 = vmatprep.subr.bf16.mxu1 %v4372_v45  ;;  %3900 = vmatprep.subr.bf16.mxu0 %v4372_v45  ;;  %v3947_v31 = vpack.c.bf16 %v3372_v28, %v3371_v18 }
 0x3bf   :  { %3942 = vmatpush1.bf16.msra.mxu1 %v3941_v59  ;;  %3902 = vmatpush1.bf16.msra.mxu0 %v3941_v59  ;;  %v3374_v59 = vld [vmem:[%s6421_s5 + $0xb8] sm:$0xff] }
 0x3c0   :  { %3943 = vmatprep.subr.bf16.mxu1 %v4372_v45  ;;  %3903 = vmatprep.subr.bf16.mxu0 %v4372_v45  ;;  %v3950_v63 = vpack.c.bf16 %v3374_v59, %v3373_v10 }
 0x3c3   :  { %3945 = vmatpush1.bf16.msra.mxu1 %v3944_v1  ;;  %3905 = vmatpush1.bf16.msra.mxu0 %v3944_v1  ;;  %v3376_v1 = vld [vmem:[%s6421_s5 + $0xc8] sm:$0x1f] }
 0x3c4   :  { %3946 = vmatprep.subr.bf16.mxu1 %v4372_v45  ;;  %3906 = vmatprep.subr.bf16.mxu0 %v4372_v45  ;;  %v3953_v10 = vpack.c.bf16 %v3376_v1, %v3375_v46 }
 0x3c7   :  { %3948 = vmatpush1.bf16.msra.mxu1 %v3947_v31  ;;  %3908 = vmatpush1.bf16.msra.mxu0 %v3947_v31 }
 0x3c8   :  { %3949 = vmatprep.subr.bf16.mxu1 %v4372_v45  ;;  %3909 = vmatprep.subr.bf16.mxu0 %v4372_v45 }
 0x3cb   :  { %3951 = vmatpush1.bf16.msra.mxu1 %v3950_v63  ;;  %3911 = vmatpush1.bf16.msra.mxu0 %v3950_v63 }
 0x3cc   :  { %3952 = vmatprep.subr.bf16.mxu1 %v4372_v45  ;;  %3912 = vmatprep.subr.bf16.mxu0 %v4372_v45 }
 0x3cf   :  { %3955 = vmatpush1.bf16.msk.msra.mxu1 %vm6056_vm11, %v3953_v10 }
 0x3d7   :  { %v2851_v18 = vpop.permute.xlu1 %2850 }
 0x3db   :  { %v2849_v28 = vpop.permute.xlu0 %2848 }
 0x3dc   :  { %v2911_v59 = vsel %vm1533_vm8, %v2849_v28, %v2851_v18 }
 0x3dd   :  { %v6063_v45 = vmax.f32 %v2719_v25, %v2911_v59 }
 0x3df   :  { %v2853_v63 = vpop.permute.xlu0 %2852  ;;  %3032 = vrot.lane.b32.xlu0 %v6063_v45, %s4368_s0 }
 0x3e0   :  { %v6071_v58 = vmax.f32 %v2721_v7, %v2853_v63  ;;  %v4332_v33 = vpop.permute.xlu1 %4331  ;;  %v2912_v1 = vsel %vm1533_vm8, %v2851_v18, %v2853_v63  ;;  %v3913_v18 = vpack.c.bf16 %v3207_v20, %v3375_v46 }
 0x3e1   :  { %v4334_v9 = vunpack.i.h.bf16 %v4332_v33  ;;  %v4333_v0 = vunpack.i.l.bf16 %v4332_v33  ;;  %v6078_v25 = vmax.f32 %v2720_v26, %v2912_v1 }
 0x3e2   :  { %3036 = vrot.lane.b32.xlu1 %v6071_v58, %s4368_s0  ;;  %3915 = vmatpush1.bf16.msk.msra.mxu0 %vm6056_vm11, %v3913_v18 }
 0x3e3   :  { %v2857_v19 = vpop.permute.xlu0 %2856  ;;  %v2910_v7 = vsel %vm1533_vm8, %v4333_v0, %v2849_v28 }
 0x3e4   :  { %v2859_v10 = vpop.permute.xlu1 %2858  ;;  %v2913_v59 = vsel %vm1533_vm8, %v4334_v9, %v2857_v19  ;;  %v6091_v44 = vmax.f32 %v2718_v5, %v2910_v7 }
 0x3e5   :  { %v6095_v26 = vmax.f32 %v2722_v49, %v2913_v59  ;;  %v2914_v16 = vsel %vm1533_vm8, %v2857_v19, %v2859_v10 }
 0x3e6   :  { %3034 = vrot.lane.b32.xlu1 %v6078_v25, %s4368_s0 }
 0x3e7   :  { %v2861_v33 = vpop.permute.xlu0 %2860  ;;  %v4350_v56 = vpack.i.bf16 %v6095_v26, %v6091_v44 }
 0x3e8   :  { %v2915_v0 = vsel %vm1533_vm8, %v2859_v10, %v2861_v33  ;;  %v6100_v9 = vmax.f32 %v2725_v60, %v2861_v33  ;;  %v2865_v46 = vpop.permute.xlu1 %2864  ;;  %v6123_v60 = vmax.f32 %v2723_v52, %v2914_v16 }
 0x3e9   :  { %v6104_v28 = vmax.f32 %v2724_v3, %v2915_v0 }
 0x3ea   :  { %3044 = vrot.lane.b32.xlu0 %v6100_v9, %s4368_s0 }
 0x3eb   :  { %v2867_v61 = vpop.permute.xlu0 %2866  ;;  %3042 = vrot.lane.b32.xlu1 %v6104_v28, %s4368_s0 }
 0x3ec   :  { %v2917_v5 = vsel %vm1533_vm8, %v2865_v46, %v2867_v61  ;;  %v2869_v49 = vpop.permute.xlu1 %2868 }
 0x3ed   :  { %v6116_v53 = vmax.f32 %v2727_v35, %v2917_v5  ;;  %v6131_v35 = vmax.f32 %v2729_v30, %v2869_v49  ;;  %v2918_v27 = vsel %vm1533_vm8, %v2867_v61, %v2869_v49 }
 0x3ee   :  { %4351 = vrot.lane.b32.xlu0 %v4350_v56, %s4368_s0  ;;  %v6152_v13 = vmax.f32 %v2728_v14, %v2918_v27 }
 0x3ef   :  { %v4337_v3 = vpop.permute.xlu0 %4336  ;;  %3048 = vrot.lane.b32.xlu1 %v6116_v53, %s4368_s0 }
 0x3f0   :  { %v4339_v31 = vunpack.i.h.bf16 %v4337_v3  ;;  %v4338_v63 = vunpack.i.l.bf16 %v4337_v3  ;;  %v2873_v1 = vpop.permute.xlu1 %2872  ;;  %v6580_v3 = vmax.f32 %v5853_v50, 0.0 }
 0x3f2   :  { %v2916_v20 = vsel %vm1533_vm8, %v4338_v63, %v2865_v46  ;;  %v2919_v19 = vsel %vm1533_vm8, %v4339_v31, %v2873_v1  ;;  %3040 = vrot.lane.b32.xlu0 %v6123_v60, %s4368_s0 }
 0x3f3   :  { %v2875_v34 = vpop.permute.xlu0 %2874  ;;  %v6136_v52 = vmax.f32 %v2726_v43, %v2916_v20  ;;  %v6140_v7 = vmax.f32 %v2730_v47, %v2919_v19 }
 0x3f4   :  { %v2877_v10 = vpop.permute.xlu1 %2876  ;;  %v2920_v43 = vsel %vm1533_vm8, %v2873_v1, %v2875_v34  ;;  %v6581_v1 = vmax.f32 %v5880_v12, 0.0 }
 0x3f5   :  { %v6144_v59 = vmax.f32 %v2733_v57, %v2877_v10  ;;  %v4355_v42 = vpack.i.bf16 %v6140_v7, %v6136_v52  ;;  %v2921_v47 = vsel %vm1533_vm8, %v2875_v34, %v2877_v10  ;;  %v6167_v14 = vmax.f32 %v2731_v39, %v2920_v43 }
 0x3f6   :  { %3052 = vrot.lane.b32.xlu0 %v6131_v35, %s4368_s0  ;;  %v6163_v57 = vmax.f32 %v2732_v62, %v2921_v47  ;;  %v6582_v34 = vmax.f32 %v5878_v4, 0.0  ;;  %v6584_v43 = vmax.f32 %v5907_v55, 0.0  ;;  %v6586_v55 = vmax.f32 %v5903_v23, 0.0 }
 0x3f7   :  { %v2881_v11 = vpop.permute.xlu0 %2880  ;;  %3060 = vrot.lane.b32.xlu1 %v6144_v59, %s4368_s0  ;;  %v6589_v23 = vmax.f32 %v5905_v21, 0.0 }
 0x3f8   :  { %v2883_v30 = vpop.permute.xlu1 %2882 }
 0x3f9   :  { %v2923_v18 = vsel %vm1533_vm8, %v2881_v11, %v2883_v30 }
 0x3fa   :  { %3050 = vrot.lane.b32.xlu0 %v6152_v13, %s4368_s0  ;;  %v6176_v15 = vmax.f32 %v2735_v6, %v2923_v18 }
 0x3fb   :  { %v2885_v40 = vpop.permute.xlu0 %2884  ;;  %4356 = vrot.lane.b32.xlu1 %v4355_v42, %s4368_s0 }
 0x3fc   :  { %v4342_v2 = vpop.permute.xlu1 %4341  ;;  %v6180_v17 = vmax.f32 %v2737_v22, %v2885_v40  ;;  %v2924_v56 = vsel %vm1533_vm8, %v2883_v30, %v2885_v40  ;;  %v6579_v22 = vmax.f32 %v5890_v36, 0.0  ;;  %v6583_v30 = vmax.f32 %v5894_v48, 0.0 }
 0x3fd   :  { %v4344_v33 = vunpack.i.h.bf16 %v4342_v2  ;;  %v4343_v0 = vunpack.i.l.bf16 %v4342_v2  ;;  %v6203_v31 = vmax.f32 %v6580_v3, %v2924_v56  ;;  %v6585_v2 = vmax.f32 %v5910_v32, 0.0 }
 0x3fe   :  { %3058 = vrot.lane.b32.xlu0 %v6163_v57, %s4368_s0  ;;  %v6588_v56 = vmax.f32 %v5930_v24, 0.0 }
 0x3ff   :  { %v2889_v46 = vpop.permute.xlu0 %2888  ;;  %3056 = vrot.lane.b32.xlu1 %v6167_v14, %s4368_s0  ;;  %v2922_v39 = vsel %vm1533_vm8, %v4343_v0, %v2881_v11 }
 0x400   :  { %v2891_v62 = vpop.permute.xlu1 %2890  ;;  %v2925_v61 = vsel %vm1533_vm8, %v4344_v33, %v2889_v46  ;;  %v6191_v38 = vmax.f32 %v2734_v51, %v2922_v39 }
 0x401   :  { %v6195_v6 = vmax.f32 %v6578_v41, %v2925_v61  ;;  %v2926_v36 = vsel %vm1533_vm8, %v2889_v46, %v2891_v62 }
 0x402   :  { %3064 = vrot.lane.b32.xlu0 %v6176_v15, %s4368_s0  ;;  %v6223_v10 = vmax.f32 %v6582_v34, %v2926_v36 }
 0x403   :  { %v2893_v5 = vpop.permute.xlu0 %2892  ;;  %3068 = vrot.lane.b32.xlu1 %v6180_v17, %s4368_s0  ;;  %v4360_v8 = vpack.i.bf16 %v6195_v6, %v6191_v38 }
 0x404   :  { %v6199_v49 = vmax.f32 %v6579_v22, %v2893_v5  ;;  %v2897_v16 = vpop.permute.xlu1 %2896  ;;  %v2927_v63 = vsel %vm1533_vm8, %v2891_v62, %v2893_v5  ;;  %v6587_v62 = vmax.f32 %v5921_v54, 0.0  ;;  %v6590_v54 = vmax.f32 %v5936_v29, 0.0 }
 0x405   :  { %v6215_v50 = vmax.f32 %v6581_v1, %v2927_v63 }
 0x406   :  { %3076 = vrot.lane.b32.xlu0 %v6199_v49, %s4368_s0 }
 0x407   :  { %v2899_v37 = vpop.permute.xlu0 %2898  ;;  %3066 = vrot.lane.b32.xlu1 %v6203_v31, %s4368_s0 }
 0x408   :  { %v2901_v51 = vpop.permute.xlu1 %2900  ;;  %v2929_v20 = vsel %vm1533_vm8, %v2897_v16, %v2899_v37 }
 0x409   :  { %v6227_v42 = vmax.f32 %v6583_v30, %v2929_v20  ;;  %v6236_v4 = vmax.f32 %v6584_v43, %v2901_v51  ;;  %v2930_v40 = vsel %vm1533_vm8, %v2899_v37, %v2901_v51 }
 0x40a   :  { %4361 = vrot.lane.b32.xlu0 %v4360_v8, %s4368_s0  ;;  %v6250_v46 = vmax.f32 %v6586_v55, %v2930_v40 }
 0x40b   :  { %v4347_v19 = vpop.permute.xlu0 %4346  ;;  %3074 = vrot.lane.b32.xlu1 %v6215_v50, %s4368_s0 }
 0x40c   :  { %v4348_v27 = vunpack.i.l.bf16 %v4347_v19  ;;  %v2905_v11 = vpop.permute.xlu1 %2904  ;;  %v4349_v18 = vunpack.i.h.bf16 %v4347_v19 }
 0x40e   :  { %v2928_v12 = vsel %vm1533_vm8, %v4348_v27, %v2897_v16  ;;  %3072 = vrot.lane.b32.xlu0 %v6223_v10, %s4368_s0  ;;  %v2931_v61 = vsel %vm1533_vm8, %v4349_v18, %v2905_v11 }
 0x40f   :  { %v2907_v47 = vpop.permute.xlu0 %2906  ;;  %3080 = vrot.lane.b32.xlu1 %v6227_v42, %s4368_s0  ;;  %v6241_v48 = vmax.f32 %v6585_v2, %v2928_v12  ;;  %v6268_v41 = vmax.f32 %v6589_v23, %v2931_v61 }
 0x410   :  { %v2932_v33 = vsel %vm1533_vm8, %v2905_v11, %v2907_v47  ;;  %v2909_v0 = vpop.permute.xlu1 %2908 }
 0x411   :  { %v6254_v39 = vmax.f32 %v6587_v62, %v2932_v33  ;;  %v2933_v32 = vsel %vm1533_vm8, %v2907_v47, %v2909_v0  ;;  %v6276_v22 = vmax.f32 %v6590_v54, %v2909_v0 }
 0x412   :  { %3084 = vrot.lane.b32.xlu0 %v6236_v4, %s4368_s0  ;;  %v6264_v5 = vmax.f32 %v6588_v56, %v2933_v32 }
 0x413   :  { %3078 = vrot.lane.b32.xlu1 %v6241_v48, %s4368_s0 }
 0x416   :  { %3082 = vrot.lane.b32.xlu0 %v6250_v46, %s4368_s0 }
 0x417   :  { %3088 = vrot.lane.b32.xlu1 %v6254_v39, %s4368_s0 }
 0x41a   :  { %3090 = vrot.lane.b32.xlu0 %v6264_v5, %s4368_s0 }
 0x41b   :  { %3086 = vrot.lane.b32.xlu1 %v6268_v41, %s4368_s0 }
 0x41e   :  { %3092 = vrot.lane.b32.xlu0 %v6276_v22, %s4368_s0 }
 0x451   :  { %v3033_v21 = vpop.permute.xlu0 %3032 }
 0x454   :  { %v3037_v24 = vpop.permute.xlu1 %3036 }
 0x455   :  { %v3153_v16 = vmax.f32 %v6071_v58, %v3037_v24 }
 0x457   :  { %3668 = vmatprep.mubr.msk.f32.mxu1 %vm3208_vm12, %v3153_v16 }
 0x458   :  { %v3035_v3 = vpop.permute.xlu1 %3034 }
 0x459   :  { %v3095_v63 = vsel %vm1082_vm6, %v3033_v21, %v3035_v3  ;;  %v3096_v37 = vsel %vm1082_vm6, %v3035_v3, %v3037_v24 }
 0x45a   :  { %v3151_v8 = vmax.f32 %v6063_v45, %v3095_v63  ;;  %v3152_v29 = vmax.f32 %v6078_v25, %v3096_v37 }
 0x45c   :  { %v3045_v51 = vpop.permute.xlu0 %3044  ;;  %3659 = vmatprep.mubr.msk.f32.mxu0 %vm3208_vm12, %v3151_v8  ;;  %3469 = vmatmul.mubr.f32.vlgmr.msra.gmra.mrb[48].mxu1 %v3152_v29 }
 0x45d   :  { %v3157_v36 = vmax.f32 %v6100_v9, %v3045_v51  ;;  %v3043_v1 = vpop.permute.xlu1 %3042 }
 0x45e   :  { %v3099_v58 = vsel %vm1082_vm6, %v3043_v1, %v3045_v51 }
 0x45f   :  { %v3156_v20 = vmax.f32 %v6104_v28, %v3099_v58  ;;  %3669 = vmatprep.mubr.msk.f32.mxu1 %vm3208_vm12, %v3157_v36 }
 0x460   :  { %v4352_v19 = vpop.permute.xlu0 %4351 }
 0x461   :  { %v4353_v34 = vunpack.i.l.bf16 %v4352_v19  ;;  %3474 = vmatmul.mubr.f32.gmra.mrb[50].mxu1 %v3156_v20  ;;  %v4354_v27 = vunpack.i.h.bf16 %v4352_v19  ;;  %v3049_v30 = vpop.permute.xlu1 %3048 }
 0x463   :  { %v3094_v45 = vsel %vm1082_vm6, %v4353_v34, %v3033_v21 }
 0x464   :  { %v3150_v25 = vmax.f32 %v6091_v44, %v3094_v45  ;;  %v3041_v11 = vpop.permute.xlu0 %3040 }
 0x465   :  { %v3097_v12 = vsel %vm1082_vm6, %v4354_v27, %v3041_v11  ;;  %v3098_v9 = vsel %vm1082_vm6, %v3041_v11, %v3043_v1 }
 0x466   :  { %v3155_v47 = vmax.f32 %v6123_v60, %v3098_v9  ;;  %3302 = vmatmul.mubr.f32.vlgmr.msra.gmra.mrb[48].mxu0 %v3150_v25  ;;  %v3154_v28 = vmax.f32 %v6095_v26, %v3097_v12 }
 0x468   :  { %v3053_v43 = vpop.permute.xlu0 %3052  ;;  %3660 = vmatprep.mubr.msk.f32.mxu0 %vm3208_vm12, %v3155_v47 }
 0x469   :  { %v3161_v40 = vmax.f32 %v6131_v35, %v3053_v43  ;;  %v3061_v2 = vpop.permute.xlu1 %3060 }
 0x46a   :  { %3307 = vmatmul.mubr.f32.gmra.mrb[50].mxu0 %v3154_v28  ;;  %v3165_v62 = vmax.f32 %v6144_v59, %v3061_v2 }
 0x46b   :  { %3670 = vmatprep.mubr.msk.f32.mxu1 %vm3208_vm12, %v3161_v40 }
 0x46c   :  { %v3051_v44 = vpop.permute.xlu0 %3050 }
 0x46d   :  { %v3101_v18 = vsel %vm1082_vm6, %v3049_v30, %v3051_v44  ;;  %v3102_v33 = vsel %vm1082_vm6, %v3051_v44, %v3053_v43  ;;  %v4357_v0 = vpop.permute.xlu1 %4356 }
 0x46e   :  { %v3159_v60 = vmax.f32 %v6116_v53, %v3101_v18  ;;  %v3160_v55 = vmax.f32 %v6152_v13, %v3102_v33  ;;  %v4358_v26 = vunpack.i.l.bf16 %v4357_v0  ;;  %v4359_v32 = vunpack.i.h.bf16 %v4357_v0 }
 0x470   :  { %v3059_v61 = vpop.permute.xlu0 %3058  ;;  %3661 = vmatprep.mubr.msk.f32.mxu0 %vm3208_vm12, %v3159_v60  ;;  %3479 = vmatmul.mubr.f32.gmra.mrb[52].mxu1 %v3160_v55  ;;  %v3100_v35 = vsel %vm1082_vm6, %v4358_v26, %v3049_v30 }
 0x471   :  { %v3105_v56 = vsel %vm1082_vm6, %v3059_v61, %v3061_v2  ;;  %3671 = vmatprep.mubr.msk.f32.mxu1 %vm3208_vm12, %v3165_v62  ;;  %v3057_v23 = vpop.permute.xlu1 %3056  ;;  %v3158_v54 = vmax.f32 %v6136_v52, %v3100_v35 }
 0x472   :  { %v3164_v53 = vmax.f32 %v6163_v57, %v3105_v56  ;;  %v3103_v13 = vsel %vm1082_vm6, %v4359_v32, %v3057_v23  ;;  %v3104_v59 = vsel %vm1082_vm6, %v3057_v23, %v3059_v61 }
 0x473   :  { %v3163_v24 = vmax.f32 %v6167_v14, %v3104_v59  ;;  %3312 = vmatmul.mubr.f32.gmra.mrb[52].mxu0 %v3158_v54  ;;  %v3162_v21 = vmax.f32 %v6140_v7, %v3103_v13 }
 0x474   :  { %v3065_v16 = vpop.permute.xlu0 %3064  ;;  %3484 = vmatmul.mubr.f32.gmra.mrb[54].mxu1 %v3164_v53 }
 0x475   :  { %v3069_v3 = vpop.permute.xlu1 %3068  ;;  %3662 = vmatprep.mubr.msk.f32.mxu0 %vm3208_vm12, %v3163_v24 }
 0x476   :  { %v3169_v63 = vmax.f32 %v6180_v17, %v3069_v3 }
 0x477   :  { %3317 = vmatmul.mubr.f32.gmra.mrb[54].mxu0 %v3162_v21 }
 0x478   :  { %v3077_v52 = vpop.permute.xlu0 %3076  ;;  %3672 = vmatprep.mubr.msk.f32.mxu1 %vm3208_vm12, %v3169_v63 }
 0x479   :  { %v3067_v57 = vpop.permute.xlu1 %3066  ;;  %v3173_v7 = vmax.f32 %v6199_v49, %v3077_v52 }
 0x47a   :  { %v3107_v37 = vsel %vm1082_vm6, %v3065_v16, %v3067_v57  ;;  %v3108_v8 = vsel %vm1082_vm6, %v3067_v57, %v3069_v3 }
 0x47b   :  { %v3167_v14 = vmax.f32 %v6176_v15, %v3107_v37  ;;  %v3168_v29 = vmax.f32 %v6203_v31, %v3108_v8 }
 0x47c   :  { %v4362_v51 = vpop.permute.xlu0 %4361 }
 0x47d   :  { %v4363_v36 = vunpack.i.l.bf16 %v4362_v51  ;;  %3489 = vmatmul.mubr.f32.gmra.mrb[56].mxu1 %v3168_v29  ;;  %v3075_v1 = vpop.permute.xlu1 %3074  ;;  %3663 = vmatprep.mubr.msk.f32.mxu0 %vm3208_vm12, %v3167_v14  ;;  %v4364_v58 = vunpack.i.h.bf16 %v4362_v51 }
 0x47e   :  { %v3111_v17 = vsel %vm1082_vm6, %v3075_v1, %v3077_v52  ;;  %3673 = vmatprep.mubr.msk.f32.mxu1 %vm3208_vm12, %v3173_v7 }
 0x47f   :  { %v3172_v20 = vmax.f32 %v6215_v50, %v3111_v17  ;;  %v3106_v19 = vsel %vm1082_vm6, %v4363_v36, %v3065_v16 }
 0x480   :  { %v3073_v15 = vpop.permute.xlu0 %3072  ;;  %v3166_v31 = vmax.f32 %v6191_v38, %v3106_v19 }
 0x481   :  { %v3109_v49 = vsel %vm1082_vm6, %v4364_v58, %v3073_v15  ;;  %v3110_v34 = vsel %vm1082_vm6, %v3073_v15, %v3075_v1  ;;  %3494 = vmatmul.mubr.f32.gmra.mrb[58].mxu1 %v3172_v20  ;;  %v3081_v27 = vpop.permute.xlu1 %3080 }
 0x482   :  { %v3171_v45 = vmax.f32 %v6223_v10, %v3110_v34  ;;  %3322 = vmatmul.mubr.f32.gmra.mrb[56].mxu0 %v3166_v31  ;;  %v3170_v25 = vmax.f32 %v6195_v6, %v3109_v49 }
 0x484   :  { %v3085_v11 = vpop.permute.xlu0 %3084  ;;  %3664 = vmatprep.mubr.msk.f32.mxu0 %vm3208_vm12, %v3171_v45 }
 0x485   :  { %v3177_v50 = vmax.f32 %v6236_v4, %v3085_v11  ;;  %v3079_v30 = vpop.permute.xlu1 %3078 }
 0x486   :  { %3327 = vmatmul.mubr.f32.gmra.mrb[58].mxu0 %v3170_v25  ;;  %v3112_v38 = vsel %vm1082_vm6, %v3079_v30, %v3081_v27 }
 0x487   :  { %3674 = vmatprep.mubr.msk.f32.mxu1 %vm3208_vm12, %v3177_v50  ;;  %v3174_v43 = vmax.f32 %v6241_v48, %v3112_v38 }
 0x488   :  { %v3083_v12 = vpop.permute.xlu0 %3082 }
 0x489   :  { %v3113_v9 = vsel %vm1082_vm6, %v3081_v27, %v3083_v12  ;;  %v3114_v47 = vsel %vm1082_vm6, %v3083_v12, %v3085_v11  ;;  %v3089_v10 = vpop.permute.xlu1 %3088 }
 0x48a   :  { %v3175_v28 = vmax.f32 %v6227_v42, %v3113_v9  ;;  %v3176_v6 = vmax.f32 %v6250_v46, %v3114_v47 }
 0x48c   :  { %v3091_v40 = vpop.permute.xlu0 %3090  ;;  %3665 = vmatprep.mubr.msk.f32.mxu0 %vm3208_vm12, %v3175_v28  ;;  %3499 = vmatmul.mubr.f32.gmra.mrb[60].mxu1 %v3176_v6 }
 0x48d   :  { %v3116_v4 = vsel %vm1082_vm6, %v3089_v10, %v3091_v40  ;;  %v3087_v2 = vpop.permute.xlu1 %3086  ;;  %3332 = vmatmul.mubr.f32.gmra.mrb[60].mxu0 %v3174_v43 }
 0x48e   :  { %v3179_v44 = vmax.f32 %v6254_v39, %v3116_v4  ;;  %v3115_v18 = vsel %vm1082_vm6, %v3087_v2, %v3089_v10 }
 0x48f   :  { %v3178_v33 = vmax.f32 %v6268_v41, %v3115_v18 }
 0x490   :  { %v3093_v0 = vpop.permute.xlu0 %3092  ;;  %3666 = vmatprep.mubr.msk.f32.mxu0 %vm3208_vm12, %v3179_v44 }
 0x491   :  { %v3117_v42 = vsel %vm1082_vm6, %v3091_v40, %v3093_v0  ;;  %v3181_v48 = vmax.f32 %v6276_v22, %v3093_v0  ;;  %3337 = vmatmul.mubr.f32.gmra.mrb[62].mxu0 %v3178_v33 }
 0x492   :  { %v3180_v46 = vmax.f32 %v6264_v5, %v3117_v42 }
 0x493   :  { %3675 = vmatprep.mubr.msk.f32.mxu1 %vm3208_vm12, %v3181_v48 }
 0x494   :  { %3504 = vmatmul.mubr.f32.gmra.mrb[62].mxu1 %v3180_v46 }
 0x52f   :  { %v3470_v60 = vpop.f32.mrb[48].mxu1 }
 0x530   :  { %3676 = vst.msk [vmem:[%s6422_s6 + $0x40] sm:$0xff] %vm3342_vm13, %v3470_v60  ;;  %v3472_v39 = vpop.f32.mrb[49].mxu1 }
 0x534   :  { %v3475_v41 = vpop.f32.mrb[50].mxu1 }
 0x535   :  { %3677 = vst.msk [vmem:[%s6422_s6 + $0x48] sm:$0xff] %vm3342_vm13, %v3475_v41  ;;  %v3477_v22 = vpop.f32.mrb[51].mxu1 }
 0x539   :  { %v3303_v55 = vpop.f32.mrb[48].mxu0 }
 0x53a   :  { %3343 = vst.msk [vmem:[%s6422_s6] sm:$0xff] %vm3342_vm13, %v3303_v55  ;;  %v3305_v5 = vpop.f32.mrb[49].mxu0 }
 0x53d   :  { %v3308_v26 = vpop.f32.mrb[50].mxu0 }
 0x53e   :  { %3344 = vst.msk [vmem:[%s6422_s6 + $0x8] sm:$0xff] %vm3342_vm13, %v3308_v26  ;;  %v3310_v62 = vpop.f32.mrb[51].mxu0 }
 0x543   :  { %v3480_v32 = vpop.f32.mrb[52].mxu1 }
 0x544   :  { %3678 = vst.msk [vmem:[%s6422_s6 + $0x50] sm:$0xff] %vm3342_vm13, %v3480_v32  ;;  %v3482_v61 = vpop.f32.mrb[53].mxu1 }
 0x546   :  { %v3313_v35 = vpop.f32.mrb[52].mxu0 }
 0x547   :  { %3345 = vst.msk [vmem:[%s6422_s6 + $0x10] sm:$0xff] %vm3342_vm13, %v3313_v35  ;;  %v3315_v56 = vpop.f32.mrb[53].mxu0  ;;  %v3485_v23 = vpop.f32.mrb[54].mxu1 }
 0x548   :  { %3679 = vst.msk [vmem:[%s6422_s6 + $0x58] sm:$0xff] %vm3342_vm13, %v3485_v23  ;;  %v3487_v54 = vpop.f32.mrb[55].mxu1 }
 0x54a   :  { %v3318_v53 = vpop.f32.mrb[54].mxu0 }
 0x54b   :  { %3346 = vst.msk [vmem:[%s6422_s6 + $0x18] sm:$0xff] %vm3342_vm13, %v3318_v53  ;;  %v3320_v13 = vpop.f32.mrb[55].mxu0 }
 0x550   :  { %v3490_v59 = vpop.f32.mrb[56].mxu1 }
 0x551   :  { %3680 = vst.msk [vmem:[%s6422_s6 + $0x60] sm:$0xff] %vm3342_vm13, %v3490_v59  ;;  %v3492_v24 = vpop.f32.mrb[57].mxu1 }
 0x554   :  { %v3495_v16 = vpop.f32.mrb[58].mxu1 }
 0x555   :  { %3681 = vst.msk [vmem:[%s6422_s6 + $0x68] sm:$0xff] %vm3342_vm13, %v3495_v16  ;;  %v3323_v21 = vpop.f32.mrb[56].mxu0  ;;  %v3497_v3 = vpop.f32.mrb[59].mxu1 }
 0x556   :  { %3347 = vst.msk [vmem:[%s6422_s6 + $0x20] sm:$0xff] %vm3342_vm13, %v3323_v21  ;;  %v3325_v63 = vpop.f32.mrb[57].mxu0 }
 0x559   :  { %v3328_v52 = vpop.f32.mrb[58].mxu0 }
 0x55a   :  { %3348 = vst.msk [vmem:[%s6422_s6 + $0x28] sm:$0xff] %vm3342_vm13, %v3328_v52  ;;  %v3330_v57 = vpop.f32.mrb[59].mxu0 }
 0x55f   :  { %v3500_v37 = vpop.f32.mrb[60].mxu1 }
 0x560   :  { %3682 = vst.msk [vmem:[%s6422_s6 + $0x70] sm:$0xff] %vm3342_vm13, %v3500_v37  ;;  %v3333_v8 = vpop.f32.mrb[60].mxu0  ;;  %v3502_v14 = vpop.f32.mrb[61].mxu1 }
 0x561   :  { %3349 = vst.msk [vmem:[%s6422_s6 + $0x30] sm:$0xff] %vm3342_vm13, %v3333_v8  ;;  %v3335_v29 = vpop.f32.mrb[61].mxu0 }
 0x564   :  { %v3338_v7 = vpop.f32.mrb[62].mxu0 }
 0x565   :  { %3350 = vst.msk [vmem:[%s6422_s6 + $0x38] sm:$0xff] %vm3342_vm13, %v3338_v7  ;;  %v3340_v51 = vpop.f32.mrb[63].mxu0 }
 0x567   :  { %v3505_v36 = vpop.f32.mrb[62].mxu1 }
 0x568   :  { %3683 = vst.msk [vmem:[%s6422_s6 + $0x78] sm:$0xff] %vm3342_vm13, %v3505_v36  ;;  %v3507_v1 = vpop.f32.mrb[63].mxu1 }

</bundles_post_ra>
